<compile_context>
chip_gen: v7x
topology: tpu7x:2x2x1
jax: 0.10.0
libtpu: 0.0.40
codegen_flags: <defaults>
</compile_context>

<pallas_src>
import jax
import jax.numpy as jnp
from jax.experimental import pallas as pl
from jax.experimental.pallas import tpu as pltpu

BN_EPS = 1e-5  # PyTorch BatchNorm2d default


# ------------------------------------------------------------ fused ConvBlock kernel ---

def _make_convblock_kernel(Hc, Wc, C, pool_input, fuse_upsample, cdtype):
    """Fused ConvBlock kernel (one image per grid step).

    [optional 2x2 avg-pool prologue]
    bn1+relu+conv3x3 -> bn2+relu+conv3x3 -> bn3+relu+conv3x3
    concat(o1, o2, o3) + identity residual
    [optional nearest-2x upsample + add(up1) epilogue]

    The pool / upsample never use strided indexing: the wrappers pass the full-resolution
    tensors bitcast to (..., W/2, 2*C) so even/odd W columns are channel halves, and
    every access is a dense full-tile load/store.
    """
    C2, C4 = C // 2, C // 4

    def kernel(*refs):
        if fuse_upsample:
            (x_ref, up_ref, s1, t1, s2, t2, s3, t3,
             w1, w2, w3, o_ref, pad_ref) = refs
        else:
            (x_ref, s1, t1, s2, t2, s3, t3,
             w1, w2, w3, o_ref, pad_ref) = refs
            up_ref = None

        # Zero ONLY the 1-pixel halo of the padded scratch (interior is fully rewritten
        # for every conv below) -- avoids a full (H+2)x(W+2)xC fill per step.
        zrow = jnp.zeros((Wc + 2, C), cdtype)
        pad_ref[0] = zrow
        pad_ref[Hc + 1] = zrow
        zcol = jnp.zeros((Hc, 1, C), cdtype)
        pad_ref[1:Hc + 1, 0:1, :] = zcol
        pad_ref[1:Hc + 1, Wc + 1:Wc + 2, :] = zcol

        if pool_input:
            # fused F.avg_pool2d(x, 2, stride=2) on the bitcast view (2Hc, Wc, 2C)
            xv = x_ref[0]
            wsum = xv[:, :, 0:C] + xv[:, :, C:2 * C]       # pool along W (channel halves)
            hsum = wsum.reshape(Hc, 2, Wc, C)              # leading-dim split (free)
            a0 = (hsum[:, 0] + hsum[:, 1]) * 0.25          # pool along H
        else:
            a0 = x_ref[0]                                  # (Hc, Wc, C)

        def bn_relu_conv3x3(a, s_ref, t_ref, w_ref, cin, cout):
            act = jnp.maximum(a * s_ref[...] + t_ref[...], 0.0)     # BN(eval)+ReLU in f32
            pad_ref[1:Hc + 1, 1:Wc + 1, 0:cin] = act.astype(cdtype)
            acc = jnp.zeros((Hc * Wc, cout), jnp.float32)
            # TODO(synk): 3 lane-aligned matmuls with K=3*cin once cin % 128 == 0.
            for dy in range(3):
                for dx in range(3):
                    patch = pad_ref[dy:dy + Hc, dx:dx + Wc, 0:cin]
                    acc = acc + jnp.dot(patch.reshape(Hc * Wc, cin), w_ref[dy, dx],
                                        preferred_element_type=jnp.float32)
            return acc.reshape(Hc, Wc, cout)

        o1 = bn_relu_conv3x3(a0, s1, t1, w1, C, C2)
        o2 = bn_relu_conv3x3(o1, s2, t2, w2, C2, C4)
        o3 = bn_relu_conv3x3(o2, s3, t3, w3, C4, C4)
        blk = jnp.concatenate([o1, o2, o3], axis=-1) + a0  # concat + identity residual

        if fuse_upsample:
            # nearest-2x upsample + residual add(up1), one dense lane-wide store:
            # H doubling is a free leading-dim broadcast/reshape; W doubling is a channel
            # concat on the (Wc, 2*C) bitcast view of the output.
            bh = jnp.broadcast_to(blk[:, None], (Hc, 2, Wc, C)).reshape(2 * Hc, Wc, C)
            o_ref[0] = up_ref[0] + jnp.concatenate([bh, bh], axis=-1)
        else:
            o_ref[0] = blk

    return kernel


def convblock(x, p, pool_input=False, upsample_add_to=None,
              compute_dtype=jnp.float32):
    """ConvBlock(C, C) with optional fused avg-pool prologue / upsample+add epilogue."""
    B, Hx, Wx, C = x.shape
    C2, C4 = C // 2, C // 4
    if pool_input:
        Hc, Wc = Hx // 2, Wx // 2
        x_in = x.reshape(B, Hx, Wc, 2 * C)   # bitcast: even/odd W -> channel halves
        x_block = (1, Hx, Wc, 2 * C)
    else:
        Hc, Wc = Hx, Wx
        x_in = x
        x_block = (1, Hc, Wc, C)

    def fold(bn, c):
        s = bn['g'] / jnp.sqrt(bn['v'] + BN_EPS)
        return s.reshape(1, c), (bn['b'] - bn['m'] * s).reshape(1, c)

    s1, t1 = fold(p['bn1'], C)
    s2, t2 = fold(p['bn2'], C2)
    s3, t3 = fold(p['bn3'], C4)
    w1 = p['w1'].astype(compute_dtype)
    w2 = p['w2'].astype(compute_dtype)
    w3 = p['w3'].astype(compute_dtype)

    fuse_up = upsample_add_to is not None
    in_arrays = [x_in]
    in_specs = [pl.BlockSpec(x_block, lambda b: (b, 0, 0, 0))]
    if fuse_up:
        up = upsample_add_to                                  # (B, 2*Hc, 2*Wc, C)
        Hu = up.shape[1]
        up_in = up.reshape(B, Hu, Wc, 2 * C)                  # free bitcast view
        in_arrays.append(up_in)
        in_specs.append(pl.BlockSpec((1, Hu, Wc, 2 * C), lambda b: (b, 0, 0, 0)))
        out_shape = (B, Hu, Wc, 2 * C)
        out_spec = pl.BlockSpec((1, Hu, Wc, 2 * C), lambda b: (b, 0, 0, 0))
    else:
        out_shape = (B, Hc, Wc, C)
        out_spec = pl.BlockSpec((1, Hc, Wc, C), lambda b: (b, 0, 0, 0))

    param_specs = [
        pl.BlockSpec((1, C), lambda b: (0, 0)), pl.BlockSpec((1, C), lambda b: (0, 0)),
        pl.BlockSpec((1, C2), lambda b: (0, 0)), pl.BlockSpec((1, C2), lambda b: (0, 0)),
        pl.BlockSpec((1, C4), lambda b: (0, 0)), pl.BlockSpec((1, C4), lambda b: (0, 0)),
        pl.BlockSpec((3, 3, C, C2), lambda b: (0, 0, 0, 0)),
        pl.BlockSpec((3, 3, C2, C4), lambda b: (0, 0, 0, 0)),
        pl.BlockSpec((3, 3, C4, C4), lambda b: (0, 0, 0, 0)),
    ]

    kernel = _make_convblock_kernel(Hc, Wc, C, pool_input, fuse_up, compute_dtype)
    out = pl.pallas_call(
        kernel,
        out_shape=jax.ShapeDtypeStruct(out_shape, jnp.float32),
        grid_spec=pltpu.PrefetchScalarGridSpec(
            num_scalar_prefetch=0,
            grid=(B,),   # TODO(synk): add an H-tile grid axis at the real 64x64x256 size
            in_specs=in_specs + param_specs,
            out_specs=out_spec,
            scratch_shapes=[pltpu.VMEM((Hc + 2, Wc + 2, C), compute_dtype)],
        ),
        compiler_params=pltpu.CompilerParams(dimension_semantics=("parallel",)),
    )(*in_arrays, s1, t1, s2, t2, s3, t3, w1, w2, w3)
    if fuse_up:
        out = out.reshape(B, Hu, 2 * Wc, C)   # bitcast back to NHWC
    return out


# -------------------------------------------------------------- CoordConv kernel -------

def _coordconv_kernel(x_ref, hm4_ref, hm2_ref, cc_ref, cp_ref, w_ref, b_ref,
                      o_ref, lc_ref):
    """AddCoordsTh(with_r, with_boundary) + 1x1 conv; one image per grid step."""
    _, H, W, C = x_ref.shape
    Cout = o_ref.shape[-1]
    # 1x1 conv over the real input channels (MXU matmul)
    out2d = jnp.dot(x_ref[0].reshape(H * W, C).astype(w_ref.dtype), w_ref[0:C, :],
                    preferred_element_type=jnp.float32) + b_ref[...]
    out = out2d.reshape(H, W, Cout)
    # coordinate-channel contributions (channel-last layout -> rank-3 broadcasts only)
    bnd3 = jnp.clip(hm4_ref[0], 0.0, 1.0)                         # (H, W, 1)
    xx3, yy3, rr3 = cc_ref[:, :, 0:1], cc_ref[:, :, 1:2], cc_ref[:, :, 2:3]
    xxb3 = jnp.where(bnd3 > 0.05, xx3, 0.0)
    yyb3 = jnp.where(bnd3 > 0.05, yy3, 0.0)
    for i, e in enumerate((xx3, yy3, rr3, xxb3, yyb3)):
        out = out + e * w_ref[C + i:C + i + 1, :].astype(jnp.float32)
    o_ref[0] = out
    # last_channel emitted lane-dense directly in its final NCHW layout (W on lanes)
    bnd2 = jnp.clip(hm2_ref[0], 0.0, 1.0)                         # (H, W)
    lc_ref[0, 0] = jnp.where(bnd2 > 0.05, cp_ref[0], 0.0)
    lc_ref[0, 1] = jnp.where(bnd2 > 0.05, cp_ref[1], 0.0)


def coordconv(x, heatmap_nchw, w, b, compute_dtype=jnp.float32):
    B, H, W, C = x.shape
    Cout = w.shape[-1]
    # Coordinate channels are image-independent: computed once here (incl. max(rr)
    # normalization) and fed with batch-invariant index_maps instead of per-image iota.
    xs = jnp.arange(H, dtype=jnp.float32) / (H - 1) * 2.0 - 1.0   # varies along H (x_dim)
    ys = jnp.arange(W, dtype=jnp.float32) / (W - 1) * 2.0 - 1.0   # varies along W (y_dim)
    xx = jnp.broadcast_to(xs[:, None], (H, W))
    yy = jnp.broadcast_to(ys[None, :], (H, W))
    rr = jnp.sqrt(xx * xx + yy * yy)
    rr = rr / jnp.max(rr)
    coords_c = jnp.stack([xx, yy, rr], axis=-1)                   # (H, W, 3)
    coords_p = jnp.stack([xx, yy], axis=0)                        # (2, H, W)
    hm4 = heatmap_nchw[:, -1:, :, :].reshape(B, H, W, 1)          # free bitcast
    hm2 = heatmap_nchw[:, -1, :, :]                               # (B, H, W)
    return pl.pallas_call(
        _coordconv_kernel,
        out_shape=(jax.ShapeDtypeStruct((B, H, W, Cout), jnp.float32),
                   jax.ShapeDtypeStruct((B, 2, H, W), jnp.float32)),
        grid_spec=pltpu.PrefetchScalarGridSpec(
            num_scalar_prefetch=0,
            grid=(B,),
            in_specs=[
                pl.BlockSpec((1, H, W, C), lambda i: (i, 0, 0, 0)),
                pl.BlockSpec((1, H, W, 1), lambda i: (i, 0, 0, 0)),
                pl.BlockSpec((1, H, W), lambda i: (i, 0, 0)),
                pl.BlockSpec((H, W, 3), lambda i: (0, 0, 0)),
                pl.BlockSpec((2, H, W), lambda i: (0, 0, 0)),
                pl.BlockSpec((C + 5, Cout), lambda i: (0, 0)),
                pl.BlockSpec((1, Cout), lambda i: (0, 0)),
            ],
            out_specs=(pl.BlockSpec((1, H, W, Cout), lambda i: (i, 0, 0, 0)),
                       pl.BlockSpec((1, 2, H, W), lambda i: (i, 0, 0, 0))),
        ),
        compiler_params=pltpu.CompilerParams(dimension_semantics=("parallel",)),
    )(x, hm4, hm2, coords_c, coords_p, w.astype(compute_dtype), b.reshape(1, Cout))


# -------------------------------------------------------------- model (glue) -----------

def hourglass_forward(params, x_nchw, heatmap_nchw, depth, compute_dtype=jnp.float32):
    # TODO(synk): first_one=True path (heatmap=None, no boundary channels) not implemented.
    x = jnp.transpose(x_nchw, (0, 2, 3, 1))                        # NCHW -> NHWC
    xc, last_channel = coordconv(x, heatmap_nchw, params['cc_w'], params['cc_b'],
                                 compute_dtype)
    blocks = params['blocks']

    def rec(level, inp):
        up1 = convblock(inp, blocks['b1_%d' % level], compute_dtype=compute_dtype)
        low1 = convblock(inp, blocks['b2_%d' % level], pool_input=True,     # fused avgpool
                         compute_dtype=compute_dtype)
        if level > 1:
            low2 = rec(level - 1, low1)
        else:
            low2 = convblock(low1, blocks['b2_plus_%d' % level],
                             compute_dtype=compute_dtype)
        # b3 with fused nearest-2x upsample + residual add of up1
        return convblock(low2, blocks['b3_%d' % level], upsample_add_to=up1,
                         compute_dtype=compute_dtype)

    out = rec(depth, xc)
    return jnp.transpose(out, (0, 3, 1, 2)), last_channel          # lc already NCHW


# --------------------------------------------------------- pure-JAX reference ----------

def _ref_bn_relu(x, bn):
    return jnp.maximum((x - bn['m']) / jnp.sqrt(bn['v'] + BN_EPS) * bn['g'] + bn['b'], 0.0)


def _ref_conv3x3(x, w):
    return jax.lax.conv_general_dilated(
        x, w, window_strides=(1, 1), padding=((1, 1), (1, 1)),
        dimension_numbers=('NHWC', 'HWIO', 'NHWC'))


def _ref_convblock(x, p):
    o1 = _ref_conv3x3(_ref_bn_relu(x, p['bn1']), p['w1'])
    o2 = _ref_conv3x3(_ref_bn_relu(o1, p['bn2']), p['w2'])
    o3 = _ref_conv3x3(_ref_bn_relu(o2, p['bn3']), p['w3'])
    return jnp.concatenate([o1, o2, o3], axis=-1) + x


def _ref_coordconv(x, hm_last, w, b):
    B, H, W, C = x.shape
    xx = jnp.broadcast_to((jnp.arange(H, dtype=jnp.float32) / (H - 1) * 2 - 1)
                          [None, :, None, None], (B, H, W, 1))
    yy = jnp.broadcast_to((jnp.arange(W, dtype=jnp.float32) / (W - 1) * 2 - 1)
                          [None, None, :, None], (B, H, W, 1))
    rr = jnp.sqrt(xx ** 2 + yy ** 2)
    rr = rr / jnp.max(rr)
    bnd = jnp.clip(hm_last, 0.0, 1.0)
    xxb = jnp.where(bnd > 0.05, xx, jnp.zeros_like(xx))
    yyb = jnp.where(bnd > 0.05, yy, jnp.zeros_like(yy))
    feats = jnp.concatenate([x, xx, yy, rr, xxb, yyb], axis=-1)
    out = jnp.einsum('bhwc,co->bhwo', feats, w) + b
    return out, jnp.concatenate([xxb, yyb], axis=-1)


def hourglass_reference(params, x_nchw, heatmap_nchw, depth):
    x = jnp.transpose(x_nchw, (0, 2, 3, 1))
    hm_last = jnp.transpose(heatmap_nchw[:, -1:, :, :], (0, 2, 3, 1))
    xc, lc = _ref_coordconv(x, hm_last, params['cc_w'], params['cc_b'])

    def rec(level, inp):
        up1 = _ref_convblock(inp, params['blocks']['b1_%d' % level])
        B, H, W, C = inp.shape
        low1 = inp.reshape(B, H // 2, 2, W // 2, 2, C).mean(axis=(2, 4))
        low1 = _ref_convblock(low1, params['blocks']['b2_%d' % level])
        if level > 1:
            low2 = rec(level - 1, low1)
        else:
            low2 = _ref_convblock(low1, params['blocks']['b2_plus_%d' % level])
        low3 = _ref_convblock(low2, params['blocks']['b3_%d' % level])
        up2 = jnp.repeat(jnp.repeat(low3, 2, axis=1), 2, axis=2)
        return up1 + up2

    out = rec(depth, xc)
    return jnp.transpose(out, (0, 3, 1, 2)), jnp.transpose(lc, (0, 3, 1, 2))


# -------------------------------------------------------------- parameter init ---------

def _init_bn(key, c):
    kg, kb, km, kv = jax.random.split(key, 4)
    return dict(
        g=jax.random.uniform(kg, (c,), jnp.float32, 0.5, 1.5),
        b=0.1 * jax.random.normal(kb, (c,), jnp.float32),
        m=0.1 * jax.random.normal(km, (c,), jnp.float32),
        v=jax.random.uniform(kv, (c,), jnp.float32, 0.5, 1.5),
    )


def _init_convblock(key, cin, cout):
    # conv weights stored as (3, 3, Cin, Cout) == PyTorch (Cout, Cin, 3, 3).transpose(2,3,1,0)
    c2, c4 = cout // 2, cout // 4
    k = jax.random.split(key, 6)
    return dict(
        bn1=_init_bn(k[0], cin),
        w1=0.05 * jax.random.normal(k[1], (3, 3, cin, c2), jnp.float32),
        bn2=_init_bn(k[2], c2),
        w2=0.05 * jax.random.normal(k[3], (3, 3, c2, c4), jnp.float32),
        bn3=_init_bn(k[4], c4),
        w3=0.05 * jax.random.normal(k[5], (3, 3, c4, c4), jnp.float32),
    )


def _block_names(level, names):
    names.append('b1_%d' % level)
    names.append('b2_%d' % level)
    if level > 1:
        _block_names(level - 1, names)
    else:
        names.append('b2_plus_%d' % level)
    names.append('b3_%d' % level)


def init_hourglass_params(key, features, depth, first_one=False):
    assert features % 4 == 0
    assert not first_one  # TODO(synk): first_one=True config not supported here
    names = []
    _block_names(depth, names)
    keys = jax.random.split(key, len(names) + 2)
    cc_in = features + 2 + 1 + 2  # +coords(2) +r(1) +boundary(2)
    return dict(
        cc_w=0.05 * jax.random.normal(keys[0], (cc_in, features), jnp.float32),
        cc_b=0.01 * jax.random.normal(keys[1], (features,), jnp.float32),
        blocks={n: _init_convblock(k, features, features)
                for n, k in zip(names, keys[2:])},
    )


# --------------------------------------------------------------------- main ------------

if __name__ == "__main__":
    key = jax.random.PRNGKey(0)
    # The module hardcodes features=256 @ 64x64; scaled-down but structurally identical.
    B, C, H, W = 2, 32, 16, 16
    HEAT_C = 3
    DEPTH = 1

    kx, kh, kp = jax.random.split(key, 3)
    x = jax.random.normal(kx, (B, C, H, W), jnp.float32)           # NCHW, like PyTorch
    heatmap = jax.random.uniform(kh, (B, HEAT_C, H, W), jnp.float32)
    params = init_hourglass_params(kp, C, DEPTH, first_one=False)

    # f32 path (strict correctness check)
    out, last_channel = hourglass_forward(params, x, heatmap, DEPTH)
    out = jax.block_until_ready(out)
    last_channel = jax.block_until_ready(last_channel)

    ref_out, ref_lc = hourglass_reference(params, x, heatmap, DEPTH)
    assert out.shape == (B, C, H, W), out.shape
    assert last_channel.shape == (B, 2, H, W), last_channel.shape
    assert jnp.allclose(out, ref_out, atol=2e-2, rtol=2e-2), \
        float(jnp.max(jnp.abs(out - ref_out)))
    assert jnp.allclose(last_channel, ref_lc, atol=1e-5, rtol=1e-5)

    # bf16 MXU path (performance configuration): loose tolerance vs. the f32 reference.
    out16, lc16 = hourglass_forward(params, x, heatmap, DEPTH,
                                    compute_dtype=jnp.bfloat16)
    out16 = jax.block_until_ready(out16)
    assert float(jnp.max(jnp.abs(out16 - ref_out))) < 0.3
    assert jnp.allclose(lc16, ref_lc, atol=1e-5, rtol=1e-5)

    print("KERNEL_OK")
</pallas_src>

<mosaic_0001>
module attributes {stable_mosaic.version = 11 : i64} {
  func.func @_coordconv_kernel(%arg0: i32, %arg1: memref<1x16x16x32xf32, #tpu.memory_space<vmem>>, %arg2: memref<1x16x16x1xf32, #tpu.memory_space<vmem>>, %arg3: memref<1x16x16xf32, #tpu.memory_space<vmem>>, %arg4: memref<16x16x3xf32, #tpu.memory_space<vmem>>, %arg5: memref<2x16x16xf32, #tpu.memory_space<vmem>>, %arg6: memref<37x32xf32, #tpu.memory_space<vmem>>, %arg7: memref<1x32xf32, #tpu.memory_space<vmem>>, %arg8: memref<1x16x16x32xf32, #tpu.memory_space<vmem>>, %arg9: memref<1x2x16x16xf32, #tpu.memory_space<vmem>>) attributes {dimension_semantics = [#tpu.dimension_semantics<parallel>], iteration_bounds = array<i64: 2>, scalar_prefetch = 0 : i64, scratch_operands = 0 : i64, tpu.core_type = #tpu.core_type<tc>, window_params = [{transform_indices = @transform_0, window_bounds = array<i64: 1, 16, 16, 32>}, {transform_indices = @transform_1, window_bounds = array<i64: 1, 16, 16, 1>}, {transform_indices = @transform_2, window_bounds = array<i64: 1, 16, 16>}, {pipeline_mode = #tpu.pipeline_mode<synchronous>, transform_indices = @transform_3, window_bounds = array<i64: 16, 16, 3>}, {pipeline_mode = #tpu.pipeline_mode<synchronous>, transform_indices = @transform_4, window_bounds = array<i64: 2, 16, 16>}, {pipeline_mode = #tpu.pipeline_mode<synchronous>, transform_indices = @transform_5, window_bounds = array<i64: 37, 32>}, {pipeline_mode = #tpu.pipeline_mode<synchronous>, transform_indices = @transform_6, window_bounds = array<i64: 1, 32>}, {transform_indices = @transform_7, window_bounds = array<i64: 1, 16, 16, 32>}, {transform_indices = @transform_8, window_bounds = array<i64: 1, 2, 16, 16>}]} {
    %c0 = arith.constant 0 : index
    %c0_0 = arith.constant 0 : index
    %c0_1 = arith.constant 0 : index
    %c0_2 = arith.constant 0 : index
    %0 = vector.load %arg1[%c0, %c0_0, %c0_1, %c0_2] : memref<1x16x16x32xf32, #tpu.memory_space<vmem>>, vector<1x16x16x32xf32>
    %1 = vector.shape_cast %0 : vector<1x16x16x32xf32> to vector<16x16x32xf32>
    %2 = vector.shape_cast %1 : vector<16x16x32xf32> to vector<256x32xf32>
    %c0_3 = arith.constant 0 : index
    %c0_4 = arith.constant 0 : index
    %3 = vector.load %arg6[%c0_3, %c0_4] : memref<37x32xf32, #tpu.memory_space<vmem>>, vector<32x32xf32>
    %cst = arith.constant dense<0.000000e+00> : vector<256x32xf32>
    %4 = tpu.matmul %2, %3, %cst {dimension_numbers = #tpu.dot_dimension_numbers<[1], [0], [0], [1], [0, 0, 1, 1], [], []>} : vector<256x32xf32>, vector<32x32xf32>, vector<256x32xf32> -> vector<256x32xf32>
    %c0_5 = arith.constant 0 : index
    %c0_6 = arith.constant 0 : index
    %5 = vector.load %arg7[%c0_5, %c0_6] : memref<1x32xf32, #tpu.memory_space<vmem>>, vector<1x32xf32>
    %6 = vector.broadcast %5 : vector<1x32xf32> to vector<256x32xf32>
    %7 = arith.addf %4, %6 : vector<256x32xf32>
    %8 = vector.shape_cast %7 : vector<256x32xf32> to vector<16x16x32xf32>
    %c0_7 = arith.constant 0 : index
    %c0_8 = arith.constant 0 : index
    %c0_9 = arith.constant 0 : index
    %c0_10 = arith.constant 0 : index
    %9 = vector.load %arg2[%c0_7, %c0_8, %c0_9, %c0_10] : memref<1x16x16x1xf32, #tpu.memory_space<vmem>>, vector<1x16x16x1xf32>
    %10 = vector.shape_cast %9 : vector<1x16x16x1xf32> to vector<16x16x1xf32>
    %cst_11 = arith.constant 0.000000e+00 : f32
    %cst_12 = arith.constant 1.000000e+00 : f32
    %11 = vector.broadcast %cst_11 : f32 to vector<16x16x1xf32>
    %12 = arith.maximumf %11, %10 : vector<16x16x1xf32>
    %13 = vector.broadcast %cst_12 : f32 to vector<16x16x1xf32>
    %14 = arith.minimumf %13, %12 : vector<16x16x1xf32>
    %c0_13 = arith.constant 0 : index
    %c0_14 = arith.constant 0 : index
    %c0_15 = arith.constant 0 : index
    %15 = vector.load %arg4[%c0_13, %c0_14, %c0_15] : memref<16x16x3xf32, #tpu.memory_space<vmem>>, vector<16x16x1xf32>
    %c0_16 = arith.constant 0 : index
    %c0_17 = arith.constant 0 : index
    %c1 = arith.constant 1 : index
    %16 = vector.load %arg4[%c0_16, %c0_17, %c1] : memref<16x16x3xf32, #tpu.memory_space<vmem>>, vector<16x16x1xf32>
    %c0_18 = arith.constant 0 : index
    %c0_19 = arith.constant 0 : index
    %c2 = arith.constant 2 : index
    %17 = vector.load %arg4[%c0_18, %c0_19, %c2] : memref<16x16x3xf32, #tpu.memory_space<vmem>>, vector<16x16x1xf32>
    %cst_20 = arith.constant 5.000000e-02 : f32
    %18 = vector.broadcast %cst_20 : f32 to vector<16x16x1xf32>
    %19 = arith.cmpf ogt, %14, %18 : vector<16x16x1xf32>
    %cst_21 = arith.constant 0.000000e+00 : f32
    %20 = vector.broadcast %cst_21 : f32 to vector<16x16x1xf32>
    %21 = arith.select %19, %15, %20 : vector<16x16x1xi1>, vector<16x16x1xf32>
    %cst_22 = arith.constant 5.000000e-02 : f32
    %22 = vector.broadcast %cst_22 : f32 to vector<16x16x1xf32>
    %23 = arith.cmpf ogt, %14, %22 : vector<16x16x1xf32>
    %cst_23 = arith.constant 0.000000e+00 : f32
    %24 = vector.broadcast %cst_23 : f32 to vector<16x16x1xf32>
    %25 = arith.select %23, %16, %24 : vector<16x16x1xi1>, vector<16x16x1xf32>
    %c32 = arith.constant 32 : index
    %c0_24 = arith.constant 0 : index
    %26 = vector.load %arg6[%c32, %c0_24] : memref<37x32xf32, #tpu.memory_space<vmem>>, vector<1x32xf32>
    %27 = vector.shape_cast %26 : vector<1x32xf32> to vector<1x1x32xf32>
    %28 = vector.broadcast %15 : vector<16x16x1xf32> to vector<16x16x32xf32>
    %29 = vector.broadcast %27 : vector<1x1x32xf32> to vector<16x16x32xf32>
    %30 = arith.mulf %28, %29 : vector<16x16x32xf32>
    %31 = arith.addf %8, %30 : vector<16x16x32xf32>
    %c33 = arith.constant 33 : index
    %c0_25 = arith.constant 0 : index
    %32 = vector.load %arg6[%c33, %c0_25] : memref<37x32xf32, #tpu.memory_space<vmem>>, vector<1x32xf32>
    %33 = vector.shape_cast %32 : vector<1x32xf32> to vector<1x1x32xf32>
    %34 = vector.broadcast %16 : vector<16x16x1xf32> to vector<16x16x32xf32>
    %35 = vector.broadcast %33 : vector<1x1x32xf32> to vector<16x16x32xf32>
    %36 = arith.mulf %34, %35 : vector<16x16x32xf32>
    %37 = arith.addf %31, %36 : vector<16x16x32xf32>
    %c34 = arith.constant 34 : index
    %c0_26 = arith.constant 0 : index
    %38 = vector.load %arg6[%c34, %c0_26] : memref<37x32xf32, #tpu.memory_space<vmem>>, vector<1x32xf32>
    %39 = vector.shape_cast %38 : vector<1x32xf32> to vector<1x1x32xf32>
    %40 = vector.broadcast %17 : vector<16x16x1xf32> to vector<16x16x32xf32>
    %41 = vector.broadcast %39 : vector<1x1x32xf32> to vector<16x16x32xf32>
    %42 = arith.mulf %40, %41 : vector<16x16x32xf32>
    %43 = arith.addf %37, %42 : vector<16x16x32xf32>
    %c35 = arith.constant 35 : index
    %c0_27 = arith.constant 0 : index
    %44 = vector.load %arg6[%c35, %c0_27] : memref<37x32xf32, #tpu.memory_space<vmem>>, vector<1x32xf32>
    %45 = vector.shape_cast %44 : vector<1x32xf32> to vector<1x1x32xf32>
    %46 = vector.broadcast %21 : vector<16x16x1xf32> to vector<16x16x32xf32>
    %47 = vector.broadcast %45 : vector<1x1x32xf32> to vector<16x16x32xf32>
    %48 = arith.mulf %46, %47 : vector<16x16x32xf32>
    %49 = arith.addf %43, %48 : vector<16x16x32xf32>
    %c36 = arith.constant 36 : index
    %c0_28 = arith.constant 0 : index
    %50 = vector.load %arg6[%c36, %c0_28] : memref<37x32xf32, #tpu.memory_space<vmem>>, vector<1x32xf32>
    %51 = vector.shape_cast %50 : vector<1x32xf32> to vector<1x1x32xf32>
    %52 = vector.broadcast %25 : vector<16x16x1xf32> to vector<16x16x32xf32>
    %53 = vector.broadcast %51 : vector<1x1x32xf32> to vector<16x16x32xf32>
    %54 = arith.mulf %52, %53 : vector<16x16x32xf32>
    %55 = arith.addf %49, %54 : vector<16x16x32xf32>
    %c0_29 = arith.constant 0 : index
    %c0_30 = arith.constant 0 : index
    %c0_31 = arith.constant 0 : index
    %c0_32 = arith.constant 0 : index
    %56 = vector.load %arg8[%c0_29, %c0_30, %c0_31, %c0_32] : memref<1x16x16x32xf32, #tpu.memory_space<vmem>>, vector<1x16x16x32xf32>
    %57 = vector.shape_cast %56 : vector<1x16x16x32xf32> to vector<16x16x32xf32>
    %58 = vector.shape_cast %55 : vector<16x16x32xf32> to vector<1x16x16x32xf32>
    tpu.vector_store %arg8[%c0_29, %c0_30, %c0_31, %c0_32], %58 {strides = array<i32>} : memref<1x16x16x32xf32, #tpu.memory_space<vmem>>, vector<1x16x16x32xf32>,
    %c0_33 = arith.constant 0 : index
    %c0_34 = arith.constant 0 : index
    %c0_35 = arith.constant 0 : index
    %59 = vector.load %arg3[%c0_33, %c0_34, %c0_35] : memref<1x16x16xf32, #tpu.memory_space<vmem>>, vector<1x16x16xf32>
    %60 = vector.shape_cast %59 : vector<1x16x16xf32> to vector<16x16xf32>
    %cst_36 = arith.constant 0.000000e+00 : f32
    %cst_37 = arith.constant 1.000000e+00 : f32
    %61 = vector.broadcast %cst_36 : f32 to vector<16x16xf32>
    %62 = arith.maximumf %61, %60 : vector<16x16xf32>
    %63 = vector.broadcast %cst_37 : f32 to vector<16x16xf32>
    %64 = arith.minimumf %63, %62 : vector<16x16xf32>
    %cst_38 = arith.constant 5.000000e-02 : f32
    %65 = vector.broadcast %cst_38 : f32 to vector<16x16xf32>
    %66 = arith.cmpf ogt, %64, %65 : vector<16x16xf32>
    %c0_39 = arith.constant 0 : index
    %c0_40 = arith.constant 0 : index
    %c0_41 = arith.constant 0 : index
    %67 = vector.load %arg5[%c0_39, %c0_40, %c0_41] : memref<2x16x16xf32, #tpu.memory_space<vmem>>, vector<1x16x16xf32>
    %68 = vector.shape_cast %67 : vector<1x16x16xf32> to vector<16x16xf32>
    %cst_42 = arith.constant 0.000000e+00 : f32
    %69 = vector.broadcast %cst_42 : f32 to vector<16x16xf32>
    %70 = arith.select %66, %68, %69 : vector<16x16xi1>, vector<16x16xf32>
    %c0_43 = arith.constant 0 : index
    %c0_44 = arith.constant 0 : index
    %c0_45 = arith.constant 0 : index
    %c0_46 = arith.constant 0 : index
    %71 = vector.load %arg9[%c0_43, %c0_44, %c0_45, %c0_46] : memref<1x2x16x16xf32, #tpu.memory_space<vmem>>, vector<1x1x16x16xf32>
    %72 = vector.shape_cast %71 : vector<1x1x16x16xf32> to vector<16x16xf32>
    %73 = vector.shape_cast %70 : vector<16x16xf32> to vector<1x1x16x16xf32>
    tpu.vector_store %arg9[%c0_43, %c0_44, %c0_45, %c0_46], %73 {strides = array<i32>} : memref<1x2x16x16xf32, #tpu.memory_space<vmem>>, vector<1x1x16x16xf32>,
    %cst_47 = arith.constant 5.000000e-02 : f32
    %74 = vector.broadcast %cst_47 : f32 to vector<16x16xf32>
    %75 = arith.cmpf ogt, %64, %74 : vector<16x16xf32>
    %c1_48 = arith.constant 1 : index
    %c0_49 = arith.constant 0 : index
    %c0_50 = arith.constant 0 : index
    %76 = vector.load %arg5[%c1_48, %c0_49, %c0_50] : memref<2x16x16xf32, #tpu.memory_space<vmem>>, vector<1x16x16xf32>
    %77 = vector.shape_cast %76 : vector<1x16x16xf32> to vector<16x16xf32>
    %cst_51 = arith.constant 0.000000e+00 : f32
    %78 = vector.broadcast %cst_51 : f32 to vector<16x16xf32>
    %79 = arith.select %75, %77, %78 : vector<16x16xi1>, vector<16x16xf32>
    %c0_52 = arith.constant 0 : index
    %c1_53 = arith.constant 1 : index
    %c0_54 = arith.constant 0 : index
    %c0_55 = arith.constant 0 : index
    %80 = vector.load %arg9[%c0_52, %c1_53, %c0_54, %c0_55] : memref<1x2x16x16xf32, #tpu.memory_space<vmem>>, vector<1x1x16x16xf32>
    %81 = vector.shape_cast %80 : vector<1x1x16x16xf32> to vector<16x16xf32>
    %82 = vector.shape_cast %79 : vector<16x16xf32> to vector<1x1x16x16xf32>
    tpu.vector_store %arg9[%c0_52, %c1_53, %c0_54, %c0_55], %82 {strides = array<i32>} : memref<1x2x16x16xf32, #tpu.memory_space<vmem>>, vector<1x1x16x16xf32>,
    return
  }
  func.func @transform_0(%arg0: i32) -> (i32, i32, i32, i32) {
    %c0_i32 = arith.constant 0 : i32
    %c0_i32_0 = arith.constant 0 : i32
    %c0_i32_1 = arith.constant 0 : i32
    %c0_i32_2 = arith.constant 0 : i32
    return %arg0, %c0_i32, %c0_i32_0, %c0_i32_1 : i32, i32, i32, i32
  }
  func.func @transform_1(%arg0: i32) -> (i32, i32, i32, i32) {
    %c0_i32 = arith.constant 0 : i32
    %c0_i32_0 = arith.constant 0 : i32
    %c0_i32_1 = arith.constant 0 : i32
    %c0_i32_2 = arith.constant 0 : i32
    return %arg0, %c0_i32, %c0_i32_0, %c0_i32_1 : i32, i32, i32, i32
  }
  func.func @transform_2(%arg0: i32) -> (i32, i32, i32) {
    %c0_i32 = arith.constant 0 : i32
    %c0_i32_0 = arith.constant 0 : i32
    %c0_i32_1 = arith.constant 0 : i32
    return %arg0, %c0_i32, %c0_i32_0 : i32, i32, i32
  }
  func.func @transform_3(%arg0: i32) -> (i32, i32, i32) {
    %c0_i32 = arith.constant 0 : i32
    %c0_i32_0 = arith.constant 0 : i32
    %c0_i32_1 = arith.constant 0 : i32
    %c0_i32_2 = arith.constant 0 : i32
    return %c0_i32, %c0_i32_0, %c0_i32_1 : i32, i32, i32
  }
  func.func @transform_4(%arg0: i32) -> (i32, i32, i32) {
    %c0_i32 = arith.constant 0 : i32
    %c0_i32_0 = arith.constant 0 : i32
    %c0_i32_1 = arith.constant 0 : i32
    %c0_i32_2 = arith.constant 0 : i32
    return %c0_i32, %c0_i32_0, %c0_i32_1 : i32, i32, i32
  }
  func.func @transform_5(%arg0: i32) -> (i32, i32) {
    %c0_i32 = arith.constant 0 : i32
    %c0_i32_0 = arith.constant 0 : i32
    %c0_i32_1 = arith.constant 0 : i32
    return %c0_i32, %c0_i32_0 : i32, i32
  }
  func.func @transform_6(%arg0: i32) -> (i32, i32) {
    %c0_i32 = arith.constant 0 : i32
    %c0_i32_0 = arith.constant 0 : i32
    %c0_i32_1 = arith.constant 0 : i32
    return %c0_i32, %c0_i32_0 : i32, i32
  }
  func.func @transform_7(%arg0: i32) -> (i32, i32, i32, i32) {
    %c0_i32 = arith.constant 0 : i32
    %c0_i32_0 = arith.constant 0 : i32
    %c0_i32_1 = arith.constant 0 : i32
    %c0_i32_2 = arith.constant 0 : i32
    return %arg0, %c0_i32, %c0_i32_0, %c0_i32_1 : i32, i32, i32, i32
  }
  func.func @transform_8(%arg0: i32) -> (i32, i32, i32, i32) {
    %c0_i32 = arith.constant 0 : i32
    %c0_i32_0 = arith.constant 0 : i32
    %c0_i32_1 = arith.constant 0 : i32
    %c0_i32_2 = arith.constant 0 : i32
    return %arg0, %c0_i32, %c0_i32_0, %c0_i32_1 : i32, i32, i32, i32
  }
}

</mosaic_0001>

<bundles_post_ra>
// kernel: tpu_custom_call.1
= control target key start
LH: loop header
LB: loop body
LE: loop exit
PB: predicated region body
PF: predicated region fallthrough
CT: control target
= control target key end

     0   :  { %14 = vsyncpa [#allocation3], 0  ;;  %s4441_s0 = inlined_call_operand.vmem [shape: f32[2,16,16,32], index: 0, kind: input, shape index: {}]   ;;  %s4442_s1 = inlined_call_operand.vmem [shape: f32[2,16,16,1], index: 1, kind: input, shape index: {}]   ;;  %s4443_s2 = inlined_call_operand.vmem [shape: f32[2,16,16], index: 2, kind: input, shape index: {}]   ;;  %s4444_s3 = inlined_call_operand.vmem [shape: f32[16,16,3], index: 3, kind: input, shape index: {}]   ;;  %s4445_s4 = inlined_call_operand.vmem [shape: f32[2,16,16], index: 4, kind: input, shape index: {}]   ;;  %s4446_s5 = inlined_call_operand.vmem [shape: f32[37,32], index: 5, kind: input, shape index: {}]   ;;  %s4447_s6 = inlined_call_operand.vmem [shape: f32[1,32], index: 6, kind: input, shape index: {}]   ;;  %s4448_s7 = inlined_call_operand.hbm [shape: f32[2,16,16,32], index: 7, kind: output, shape index: {0}]   ;;  %s4449_s8 = inlined_call_operand.hbm [shape: f32[2,2,16,16], index: 8, kind: output, shape index: {1}]  }
   0x1   :  { %16 = vsyncpa [#allocation3 + $0x1], 0 }
   0x2   :  { %17 = vsyncpa [#allocation5], 0 }
   0x3   :  { %19 = vsyncpa [#allocation5 + $0x1], 0  ;;  %s2708_s27 = smov 0   ;;  %s2710_s28 = smov 0  }
   0x4   :  { %s2712_s29 = smov 0   ;;  %s2714_s30 = smov 0  }
   0x5 LB: > { %s2729_s9 = sadd.s32 4294967295, %s2653_s30   ;;  %s2329_s10 = sadd.s32 4294967294, %s2653_s30   ;;  %s2653_s30 = sphi %s2714_s30, %s4763_s30   ;;  %s2649_s29 = sphi %s2712_s29, %s4762_s29   ;;  %s2645_s28 = sphi %s2710_s28, %s4761_s28   ;;  %s2641_s27 = sphi %s2708_s27, %s4760_s27  }
   0x6   : > { %s2733_s11 = sadd.s32 1, %s2653_s30   ;;  %s194_s12 = sadd.s32 1, %s2649_s29 }
   0x7   : > { %s191_s13 = ssub.s32 %s2653_s30, %s2733_s11  ;;  %p204_p0 = scmp.ne.s32.totalorder %s2649_s29, %s2645_s28 }
   0x8   : > { %p192_p1 = scmp.eq.s32.totalorder %s191_s13, 0  ;;  %p205_p2 = scmp.eq.s32.totalorder %s2729_s9, 1 }
   0x9   : > { %p210_p3 = scmp.ne.s32.totalorder %s2645_s28, %s2641_s27  ;;  %p211_p4 = scmp.eq.s32.totalorder %s2329_s10, 1 }
   0xa   : > { %s2744_s14 = scalar_select %p192_p1, %s2649_s29, %s194_s12  }
   0xb   : > { %p2746_p5 = por %p205_p2, %p204_p0  ;;  %p2750_p6 = por %p211_p4, %p210_p3 }
   0xc   : > { %p2332_p7 = scmp.ge.s32.totalorder %s2653_s30, 1  ;;  %p291_p8 = scmp.lt.s32.totalorder %s2653_s30, 3 }
   0xe   : > { %p292_p9 = pnand %p2332_p7, %p291_p8 }
  0x10   : > { %295 = sbr.rel (%p292_p9) target bundleno = 570 (0x23a), region = 48 }
  0x17   : > { %v2759_v0 = vld [vmem:[%s4444_s3 + $0x10] sm:$0xff]  ;;  %v2764_v1 = vld [vmem:[%s4444_s3] sm:$0xff]  ;;  %p340_p10 = scmp.lt.s32.totalorder %s2729_s9, 1  ;;  %s2655_s23 = smov 127   ;;  %v388_v3 = vld [vmem:[%s4446_s5 + $0x8] sm:$0xff]  ;;  %v2656_v8 = vmov 1  }
  0x18   : > { %v387_v2 = vld [vmem:[%s4446_s5] sm:$0xff]  ;;  %948 = vrot.lane.b32.xlu1 %v2759_v0, %s2655_s23  ;;  %944 = vrot.lane.b32.xlu0 %v2764_v1, %s2655_s23  ;;  %v2780_v5 = vld [vmem:[%s4444_s3 + $0x18] sm:$0xff]  ;;  %v4451_v9 = vmov 0   ;;  %vm4454_vm0 = vcmask 261120   ;;  %s2395_s12 = sshll.u32 %s2729_s9, 9  ;;  %s2659_s24 = smov [#allocation4]  }
  0x19   : > { %v2488_v4 = vpack.c.bf16 %v388_v3, %v387_v2  ;;  %v389_v6 = vld [vmem:[%s4446_s5 + $0x10] sm:$0xff]  ;;  %v390_v7 = vld [vmem:[%s4446_s5 + $0x18] sm:$0xff]  ;;  %s2789_s19 = scalar_select %p340_p10, %s2729_s9, 1  ;;  %2552 = vset.pattern.permute.xlu0 %v2656_v8  ;;  %2550 = vset.pattern.permute.xlu1 %v4451_v9  ;;  %v2796_v10 = vld [vmem:[%s4444_s3 + $0x8] sm:$0xff] }
  0x1a   : > { %v2492_v11 = vpack.c.bf16 %v390_v7, %v389_v6  ;;  %v2813_v12 = vld [vmem:[%s4444_s3 + $0x28] sm:$0xff]  ;;  %v2820_v15 = vld [vmem:[%s4444_s3 + $0x20] sm:$0xff]  ;;  %v2833_v18 = vld [vmem:[%s4444_s3 + $0x38] sm:$0xff]  ;;  %s4053_s18 = scalar_lea.hbm %s4449_s8, %s2395_s12  ;;  %s2563_s25 = sshll.u32 %s2659_s24, 4  ;;  %s2564_s25 = int_to_ptr.vmem [resolvable:$false] %s2563_s25 }
  0x1b   : > { %2489 = vmatprep.subr.bf16.mxu0 %v2488_v4  ;;  %2496 = vmatprep.subr.bf16.mxu1 %v2488_v4  ;;  %s2391_s22 = sshll.u32 %s2789_s19, 8  ;;  %v2838_v19 = vld [vmem:[%s4444_s3 + $0x30] sm:$0xff]  ;;  %v2854_v24 = vld [vmem:[%s4444_s3 + $0x48] sm:$0xff]  ;;  %v2860_v25 = vld [vmem:[%s4444_s3 + $0x40] sm:$0xff] }
  0x1c   : > { %2491 = vmatpush3.bf16.msra.mxu0 %v2488_v4  ;;  %950 = vrot.lane.b32.xlu1 %v2780_v5, %s2655_s23  ;;  %s2806_s26 = scalar_lea.vmem %s4441_s0, %s2391_s22  ;;  %v2876_v30 = vld [vmem:[%s4444_s3 + $0x58] sm:$0xff]  ;;  %v2882_v31 = vld [vmem:[%s4444_s3 + $0x50] sm:$0xff]  ;;  %v2898_v36 = vld [vmem:[%s4444_s3 + $0x68] sm:$0xff]  ;;  %s3312_s10 = scalar_lea.vmem %s4442_s1, %s2391_s22 }
  0x1d   : > { %946 = vrot.lane.b32.xlu0 %v2796_v10, %s2655_s23  ;;  %2498 = vmatpush3.bf16.msra.mxu1 %v2488_v4  ;;  %v355_v13 = vld [vmem:[%s2806_s26] sm:$0xff]  ;;  %v356_v16 = vld [vmem:[%s2806_s26 + $0x8] sm:$0xff]  ;;  %v357_v20 = vld [vmem:[%s2806_s26 + $0x10] sm:$0xff] }
  0x1e   : > { %v371_v14 = vld [vmem:[%s2806_s26 + $0x80] sm:$0xff]  ;;  %2493 = vmatprep.subr.bf16.mxu0 %v2492_v11  ;;  %2497 = vmatprep.subr.bf16.mxu1 %v2492_v11  ;;  %v372_v17 = vld [vmem:[%s2806_s26 + $0x88] sm:$0xff]  ;;  %v373_v21 = vld [vmem:[%s2806_s26 + $0x90] sm:$0xff] }
  0x1f   : > { %2440 = vmatprep.mubr.msk.f32.mxu0 %vm4454_vm0, %v355_v13  ;;  %2464 = vmatprep.mubr.msk.f32.mxu1 %vm4454_vm0, %v371_v14  ;;  %v358_v22 = vld [vmem:[%s2806_s26 + $0x18] sm:$0xff]  ;;  %v359_v26 = vld [vmem:[%s2806_s26 + $0x20] sm:$0xff]  ;;  %v360_v28 = vld [vmem:[%s2806_s26 + $0x28] sm:$0xff] }
  0x20   : > { %2495 = vmatpush3.bf16.msra.mxu0 %v2492_v11  ;;  %954 = vrot.lane.b32.xlu1 %v2813_v12, %s2655_s23  ;;  %v374_v23 = vld [vmem:[%s2806_s26 + $0x98] sm:$0xff]  ;;  %v375_v27 = vld [vmem:[%s2806_s26 + $0xa0] sm:$0xff]  ;;  %v376_v29 = vld [vmem:[%s2806_s26 + $0xa8] sm:$0xff] }
  0x21   : > { %952 = vrot.lane.b32.xlu0 %v2820_v15, %s2655_s23  ;;  %2499 = vmatpush3.bf16.msra.mxu1 %v2492_v11  ;;  %v361_v32 = vld [vmem:[%s2806_s26 + $0x30] sm:$0xff]  ;;  %v362_v34 = vld [vmem:[%s2806_s26 + $0x38] sm:$0xff]  ;;  %v2904_v37 = vld [vmem:[%s4444_s3 + $0x60] sm:$0xff] }
  0x22   : > { %v377_v33 = vld [vmem:[%s2806_s26 + $0xb0] sm:$0xff]  ;;  %v378_v35 = vld [vmem:[%s2806_s26 + $0xb8] sm:$0xff]  ;;  %v363_v38 = vld [vmem:[%s2806_s26 + $0x40] sm:$0xff] }
  0x23   : > { %2441 = vmatmul.mubr.msk.f32.vlgmr.msra.gmra.mrb[0].mxu0 %vm4454_vm0, %v356_v16  ;;  %v379_v39 = vld [vmem:[%s2806_s26 + $0xc0] sm:$0xff]  ;;  %v364_v40 = vld [vmem:[%s2806_s26 + $0x48] sm:$0xff]  ;;  %v2920_v42 = vld [vmem:[%s4444_s3 + $0x78] sm:$0xff] }
  0x24   : > { %2465 = vmatmul.mubr.msk.f32.vlgmr.msra.gmra.mrb[0].mxu1 %vm4454_vm0, %v372_v17  ;;  %958 = vrot.lane.b32.xlu1 %v2833_v18, %s2655_s23  ;;  %v380_v41 = vld [vmem:[%s2806_s26 + $0xc8] sm:$0xff]  ;;  %v2926_v43 = vld [vmem:[%s4444_s3 + $0x70] sm:$0xff]  ;;  %v366_v46 = vld [vmem:[%s2806_s26 + $0x58] sm:$0xff] }
  0x25   : > { %956 = vrot.lane.b32.xlu0 %v2838_v19, %s2655_s23  ;;  %2443 = vmatprep.mubr.msk.f32.mxu0 %vm4454_vm0, %v357_v20  ;;  %v365_v44 = vld [vmem:[%s2806_s26 + $0x50] sm:$0xff]  ;;  %v382_v47 = vld [vmem:[%s2806_s26 + $0xd8] sm:$0xff]  ;;  %v2942_v48 = vld [vmem:[%s4444_s3 + $0x88] sm:$0xff] }
  0x26   : > { %2467 = vmatprep.mubr.msk.f32.mxu1 %vm4454_vm0, %v373_v21  ;;  %v381_v45 = vld [vmem:[%s2806_s26 + $0xd0] sm:$0xff]  ;;  %v2948_v49 = vld [vmem:[%s4444_s3 + $0x80] sm:$0xff]  ;;  %v368_v52 = vld [vmem:[%s2806_s26 + $0x68] sm:$0xff] }
  0x27   : > { %2444 = vmatmul.mubr.msk.f32.gmra.mrb[2].mxu0 %vm4454_vm0, %v358_v22  ;;  %v367_v50 = vld [vmem:[%s2806_s26 + $0x60] sm:$0xff]  ;;  %v384_v53 = vld [vmem:[%s2806_s26 + $0xe8] sm:$0xff]  ;;  %v2964_v54 = vld [vmem:[%s4444_s3 + $0x98] sm:$0xff] }
  0x28   : > { %2468 = vmatmul.mubr.msk.f32.gmra.mrb[2].mxu1 %vm4454_vm0, %v374_v23  ;;  %962 = vrot.lane.b32.xlu1 %v2854_v24, %s2655_s23  ;;  %v383_v51 = vld [vmem:[%s2806_s26 + $0xe0] sm:$0xff]  ;;  %v2970_v55 = vld [vmem:[%s4444_s3 + $0x90] sm:$0xff]  ;;  %v370_v58 = vld [vmem:[%s2806_s26 + $0x78] sm:$0xff] }
  0x29   : > { %960 = vrot.lane.b32.xlu0 %v2860_v25, %s2655_s23  ;;  %2446 = vmatprep.mubr.msk.f32.mxu0 %vm4454_vm0, %v359_v26  ;;  %v369_v56 = vld [vmem:[%s2806_s26 + $0x70] sm:$0xff]  ;;  %v386_v59 = vld [vmem:[%s2806_s26 + $0xf8] sm:$0xff]  ;;  %v2986_v60 = vld [vmem:[%s4444_s3 + $0xa8] sm:$0xff]  ;;  %v4450_v26 = vmov 2  }
  0x2a   : > { %2470 = vmatprep.mubr.msk.f32.mxu1 %vm4454_vm0, %v375_v27  ;;  %v385_v57 = vld [vmem:[%s2806_s26 + $0xf0] sm:$0xff]  ;;  %v2992_v61 = vld [vmem:[%s4444_s3 + $0xa0] sm:$0xff]  ;;  %v3003_v62 = vld [vmem:[%s4444_s3 + $0xb8] sm:$0xff]  ;;  %s2393_s26 = sshll.u32 %s2789_s19, 4  ;;  %s4030_s19 = sand.u32 1, %s2645_s28  }
  0x2b   : > { %2447 = vmatmul.mubr.msk.f32.gmra.mrb[4].mxu0 %vm4454_vm0, %v360_v28  ;;  %v3008_v63 = vld [vmem:[%s4444_s3 + $0xb0] sm:$0xff]  ;;  %v3017_v2 = vld [vmem:[%s4444_s3 + $0xc8] sm:$0xff]  ;;  %v3022_v3 = vld [vmem:[%s4444_s3 + $0xc0] sm:$0xff]  ;;  %s354_s13 = scalar_lea.vmem %s4443_s2, %s2393_s26  ;;  %s2334_s22 = sshll.u32 %s4030_s19, 5 }
  0x2c   : > { %2471 = vmatmul.mubr.msk.f32.gmra.mrb[4].mxu1 %vm4454_vm0, %v376_v29  ;;  %966 = vrot.lane.b32.xlu1 %v2876_v30, %s2655_s23  ;;  %v3031_v4 = vld [vmem:[%s4444_s3 + $0xd8] sm:$0xff]  ;;  %v3036_v6 = vld [vmem:[%s4444_s3 + $0xd0] sm:$0xff]  ;;  %v3045_v7 = vld [vmem:[%s4444_s3 + $0xe8] sm:$0xff] }
  0x2d   : > { %964 = vrot.lane.b32.xlu0 %v2882_v31, %s2655_s23  ;;  %2449 = vmatprep.mubr.msk.f32.mxu0 %vm4454_vm0, %v361_v32  ;;  %v3050_v11 = vld [vmem:[%s4444_s3 + $0xe0] sm:$0xff]  ;;  %v3059_v13 = vld [vmem:[%s4444_s3 + $0xf8] sm:$0xff]  ;;  %v3064_v14 = vld [vmem:[%s4444_s3 + $0xf0] sm:$0xff] }
  0x2e   : > { %2473 = vmatprep.mubr.msk.f32.mxu1 %vm4454_vm0, %v377_v33 }
  0x2f   : > { %2450 = vmatmul.mubr.msk.f32.gmra.mrb[6].mxu0 %vm4454_vm0, %v362_v34 }
  0x30   : > { %2474 = vmatmul.mubr.msk.f32.gmra.mrb[6].mxu1 %vm4454_vm0, %v378_v35  ;;  %970 = vrot.lane.b32.xlu1 %v2898_v36, %s2655_s23 }
  0x31   : > { %968 = vrot.lane.b32.xlu0 %v2904_v37, %s2655_s23  ;;  %2452 = vmatprep.mubr.msk.f32.mxu0 %vm4454_vm0, %v363_v38 }
  0x32   : > { %2476 = vmatprep.mubr.msk.f32.mxu1 %vm4454_vm0, %v379_v39 }
  0x33   : > { %2453 = vmatmul.mubr.msk.f32.gmra.mrb[8].mxu0 %vm4454_vm0, %v364_v40 }
  0x34   : > { %2477 = vmatmul.mubr.msk.f32.gmra.mrb[8].mxu1 %vm4454_vm0, %v380_v41  ;;  %974 = vrot.lane.b32.xlu1 %v2920_v42, %s2655_s23 }
  0x35   : > { %972 = vrot.lane.b32.xlu0 %v2926_v43, %s2655_s23  ;;  %2455 = vmatprep.mubr.msk.f32.mxu0 %vm4454_vm0, %v365_v44 }
  0x36   : > { %2479 = vmatprep.mubr.msk.f32.mxu1 %vm4454_vm0, %v381_v45 }
  0x37   : > { %2456 = vmatmul.mubr.msk.f32.gmra.mrb[10].mxu0 %vm4454_vm0, %v366_v46 }
  0x38   : > { %2480 = vmatmul.mubr.msk.f32.gmra.mrb[10].mxu1 %vm4454_vm0, %v382_v47  ;;  %978 = vrot.lane.b32.xlu1 %v2942_v48, %s2655_s23 }
  0x39   : > { %976 = vrot.lane.b32.xlu0 %v2948_v49, %s2655_s23  ;;  %2458 = vmatprep.mubr.msk.f32.mxu0 %vm4454_vm0, %v367_v50 }
  0x3a   : > { %2482 = vmatprep.mubr.msk.f32.mxu1 %vm4454_vm0, %v383_v51 }
  0x3b   : > { %2459 = vmatmul.mubr.msk.f32.gmra.mrb[12].mxu0 %vm4454_vm0, %v368_v52 }
  0x3c   : > { %2483 = vmatmul.mubr.msk.f32.gmra.mrb[12].mxu1 %vm4454_vm0, %v384_v53  ;;  %982 = vrot.lane.b32.xlu1 %v2964_v54, %s2655_s23 }
  0x3d   : > { %980 = vrot.lane.b32.xlu0 %v2970_v55, %s2655_s23  ;;  %2461 = vmatprep.mubr.msk.f32.mxu0 %vm4454_vm0, %v369_v56 }
  0x3e   : > { %2485 = vmatprep.mubr.msk.f32.mxu1 %vm4454_vm0, %v385_v57 }
  0x3f   : > { %2462 = vmatmul.mubr.msk.f32.gmra.mrb[14].mxu0 %vm4454_vm0, %v370_v58 }
  0x40   : > { %2486 = vmatmul.mubr.msk.f32.gmra.mrb[14].mxu1 %vm4454_vm0, %v386_v59  ;;  %986 = vrot.lane.b32.xlu1 %v2986_v60, %s2655_s23 }
  0x41   : > { %984 = vrot.lane.b32.xlu0 %v2992_v61, %s2655_s23 }
  0x44   : > { %990 = vrot.lane.b32.xlu1 %v3003_v62, %s2655_s23 }
  0x45   : > { %988 = vrot.lane.b32.xlu0 %v3008_v63, %s2655_s23 }
  0x48   : > { %994 = vrot.lane.b32.xlu1 %v3017_v2, %s2655_s23 }
  0x49   : > { %992 = vrot.lane.b32.xlu0 %v3022_v3, %s2655_s23 }
  0x4c   : > { %998 = vrot.lane.b32.xlu1 %v3031_v4, %s2655_s23 }
  0x4d   : > { %996 = vrot.lane.b32.xlu0 %v3036_v6, %s2655_s23 }
  0x50   : > { %1002 = vrot.lane.b32.xlu1 %v3045_v7, %s2655_s23 }
  0x51   : > { %1000 = vrot.lane.b32.xlu0 %v3050_v11, %s2655_s23 }
  0x54   : > { %1006 = vrot.lane.b32.xlu1 %v3059_v13, %s2655_s23 }
  0x55   : > { %1004 = vrot.lane.b32.xlu0 %v3064_v14, %s2655_s23  ;;  %s2565_s23 = scalar_lea.vmem %s2564_s25, 1024 }
  0x58   : > { %1078 = vperm.xlu1 %2550, %v2796_v10  }
  0x59   : > { %1275 = vperm.xlu0 %2552, %v2796_v10  }
  0x5c   : > { %1082 = vperm.xlu1 %2550, %v2759_v0  }
  0x5d   : > { %1287 = vperm.xlu0 %2552, %v2820_v15  }
  0x60   : > { %1090 = vperm.xlu1 %2550, %v2820_v15  }
  0x61   : > { %1295 = vperm.xlu0 %2552, %v2838_v19  }
  0x64   : > { %1098 = vperm.xlu1 %2550, %v2838_v19  }
  0x65   : > { %1303 = vperm.xlu0 %2552, %v2860_v25  }
  0x68   : > { %1106 = vperm.xlu1 %2550, %v2860_v25  }
  0x69   : > { %1311 = vperm.xlu0 %2552, %v2882_v31  }
  0x6c   : > { %1114 = vperm.xlu1 %2550, %v2882_v31  }
  0x6d   : > { %1319 = vperm.xlu0 %2552, %v2904_v37  }
  0x70   : > { %1122 = vperm.xlu1 %2550, %v2904_v37  }
  0x71   : > { %1327 = vperm.xlu0 %2552, %v2926_v43  }
  0x74   : > { %1130 = vperm.xlu1 %2550, %v2926_v43  }
  0x75   : > { %1335 = vperm.xlu0 %2552, %v2948_v49  }
  0x78   : > { %1138 = vperm.xlu1 %2550, %v2948_v49  }
  0x79   : > { %1343 = vperm.xlu0 %2552, %v2970_v55  }
  0x7c   : > { %1146 = vperm.xlu1 %2550, %v2970_v55  }
  0x7d   : > { %1351 = vperm.xlu0 %2552, %v2992_v61  }
  0x80   : > { %1154 = vperm.xlu1 %2550, %v2992_v61  }
  0x81   : > { %1359 = vperm.xlu0 %2552, %v3008_v63  }
  0x84   : > { %1162 = vperm.xlu1 %2550, %v3008_v63  }
  0x85   : > { %1367 = vperm.xlu0 %2552, %v3022_v3  }
  0x88   : > { %1170 = vperm.xlu1 %2550, %v3022_v3  }
  0x89   : > { %1375 = vperm.xlu0 %2552, %v3036_v6  }
  0x8a   : > { %v3096_v16 = vpop.permute.xlu1 %948  ;;  %v3098_v17 = vpop.permute.xlu0 %944 }
  0x8c   : > { %1178 = vperm.xlu1 %2550, %v3036_v6  }
  0x8d   : > { %1383 = vperm.xlu0 %2552, %v3050_v11  }
  0x8e   : > { %v3102_v20 = vpop.permute.xlu1 %950 }
  0x8f   : > { %4471 = vst [vmem:[#allocation8_spill] sm:$0xff] %v3102_v20  ;;  %v3104_v21 = vpop.permute.xlu0 %946 }
  0x90   : > { %4472 = vst [vmem:[#allocation9_spill] sm:$0xff] %v3104_v21  ;;  %1186 = vperm.xlu1 %2550, %v3050_v11  }
  0x91   : > { %1391 = vperm.xlu0 %2552, %v3064_v14  }
  0x92   : > { %v3108_v22 = vpop.permute.xlu1 %954 }
  0x93   : > { %4473 = vst [vmem:[#allocation10_spill] sm:$0xff] %v3108_v22  ;;  %v3110_v23 = vpop.permute.xlu0 %952 }
  0x94   : > { %1194 = vperm.xlu1 %2550, %v3064_v14  }
  0x95   : > { %2553 = vset.pattern.permute.xlu0 %v4450_v26 }
  0x96   : > { %1468 = vperm.xlu0 %2553, %v2764_v1   ;;  %v3115_v27 = vpop.permute.xlu1 %958 }
  0x97   : > { %4474 = vst [vmem:[#allocation11_spill] sm:$0xff] %v3115_v27  ;;  %v3117_v28 = vpop.permute.xlu0 %956 }
  0x98   : > { %2551 = vset.pattern.permute.xlu1 %v2656_v8 }
  0x99   : > { %1271 = vperm.xlu1 %2551, %v2764_v1  }
  0x9a   : > { %1480 = vperm.xlu0 %2553, %v2780_v5   ;;  %v3122_v29 = vpop.permute.xlu1 %962 }
  0x9b   : > { %4475 = vst [vmem:[#allocation12_spill] sm:$0xff] %v3122_v29  ;;  %v3124_v32 = vpop.permute.xlu0 %960 }
  0x9c   : > { %4476 = vst [vmem:[#allocation13_spill] sm:$0xff] %v3124_v32 }
  0x9d   : > { %1279 = vperm.xlu1 %2551, %v2759_v0  }
  0x9e   : > { %1488 = vperm.xlu0 %2553, %v2813_v12   ;;  %v3128_v33 = vpop.permute.xlu1 %966 }
  0x9f   : > { %4477 = vst [vmem:[#allocation14_spill] sm:$0xff] %v3128_v33  ;;  %v3130_v34 = vpop.permute.xlu0 %964 }
  0xa0   : > { %4478 = vst [vmem:[#allocation15_spill] sm:$0xff] %v3130_v34 }
  0xa1   : > { %1283 = vperm.xlu1 %2551, %v2780_v5  }
  0xa2   : > { %1496 = vperm.xlu0 %2553, %v2833_v18   ;;  %v3134_v8 = vpop.permute.xlu1 %970 }
  0xa3   : > { %4479 = vst [vmem:[#allocation16_spill] sm:$0xff] %v3134_v8  ;;  %v3136_v35 = vpop.permute.xlu0 %968 }
  0xa4   : > { %4480 = vst [vmem:[#allocation17_spill] sm:$0xff] %v3136_v35 }
  0xa5   : > { %1291 = vperm.xlu1 %2551, %v2813_v12  }
  0xa6   : > { %1504 = vperm.xlu0 %2553, %v2854_v24   ;;  %v3140_v38 = vpop.permute.xlu1 %974 }
  0xa7   : > { %4481 = vst [vmem:[#allocation18_spill] sm:$0xff] %v3140_v38  ;;  %v3142_v39 = vpop.permute.xlu0 %972 }
  0xa8   : > { %4482 = vst [vmem:[#allocation19_spill] sm:$0xff] %v3142_v39 }
  0xa9   : > { %1299 = vperm.xlu1 %2551, %v2833_v18  }
  0xaa   : > { %1512 = vperm.xlu0 %2553, %v2876_v30   ;;  %v3146_v40 = vpop.permute.xlu1 %978 }
  0xab   : > { %4483 = vst [vmem:[#allocation20_spill] sm:$0xff] %v3146_v40  ;;  %v3148_v41 = vpop.permute.xlu0 %976 }
  0xac   : > { %4484 = vst [vmem:[#allocation21_spill] sm:$0xff] %v3148_v41 }
  0xad   : > { %1307 = vperm.xlu1 %2551, %v2854_v24  }
  0xae   : > { %1520 = vperm.xlu0 %2553, %v2898_v36   ;;  %v3152_v44 = vpop.permute.xlu1 %982 }
  0xaf   : > { %4485 = vst [vmem:[#allocation22_spill] sm:$0xff] %v3152_v44  ;;  %v3154_v45 = vpop.permute.xlu0 %980 }
  0xb0   : > { %4486 = vst [vmem:[#allocation23_spill] sm:$0xff] %v3154_v45 }
  0xb1   : > { %1315 = vperm.xlu1 %2551, %v2876_v30  }
  0xb2   : > { %1528 = vperm.xlu0 %2553, %v2920_v42   ;;  %v3160_v47 = vpop.permute.xlu1 %986 }
  0xb3   : > { %v3158_v46 = vpop.permute.xlu0 %984  ;;  %4488 = vst [vmem:[#allocation25_spill] sm:$0xff] %v3160_v47 }
  0xb4   : > { %4487 = vst [vmem:[#allocation24_spill] sm:$0xff] %v3158_v46 }
  0xb5   : > { %1323 = vperm.xlu1 %2551, %v2898_v36  }
  0xb6   : > { %1536 = vperm.xlu0 %2553, %v2942_v48   ;;  %v3168_v51 = vpop.permute.xlu1 %990 }
  0xb7   : > { %v3166_v50 = vpop.permute.xlu0 %988  ;;  %4490 = vst [vmem:[#allocation27_spill] sm:$0xff] %v3168_v51 }
  0xb8   : > { %4489 = vst [vmem:[#allocation26_spill] sm:$0xff] %v3166_v50 }
  0xb9   : > { %1331 = vperm.xlu1 %2551, %v2920_v42  }
  0xba   : > { %1544 = vperm.xlu0 %2553, %v2964_v54   ;;  %v3174_v53 = vpop.permute.xlu1 %994 }
  0xbb   : > { %v3172_v52 = vpop.permute.xlu0 %992  ;;  %4492 = vst [vmem:[#allocation29_spill] sm:$0xff] %v3174_v53 }
  0xbc   : > { %4491 = vst [vmem:[#allocation28_spill] sm:$0xff] %v3172_v52 }
  0xbd   : > { %1339 = vperm.xlu1 %2551, %v2942_v48  }
  0xbe   : > { %1552 = vperm.xlu0 %2553, %v2986_v60   ;;  %v3182_v57 = vpop.permute.xlu1 %998 }
  0xbf   : > { %v3180_v56 = vpop.permute.xlu0 %996  ;;  %4494 = vst [vmem:[#allocation31_spill] sm:$0xff] %v3182_v57  ;;  %v4499_v57 = vmov 0  }
  0xc0   : > { %4493 = vst [vmem:[#allocation30_spill] sm:$0xff] %v3180_v56 }
  0xc1   : > { %1347 = vperm.xlu1 %2551, %v2964_v54  }
  0xc2   : > { %1560 = vperm.xlu0 %2553, %v3003_v62   ;;  %v3188_v59 = vpop.permute.xlu1 %1002 }
  0xc3   : > { %v3186_v58 = vpop.permute.xlu0 %1000  ;;  %4496 = vst [vmem:[#allocation33_spill] sm:$0xff] %v3188_v59 }
  0xc4   : > { %4495 = vst [vmem:[#allocation32_spill] sm:$0xff] %v3186_v58 }
  0xc5   : > { %1355 = vperm.xlu1 %2551, %v2986_v60  }
  0xc6   : > { %1568 = vperm.xlu0 %2553, %v3017_v2   ;;  %v3196_v9 = vpop.permute.xlu1 %1006 }
  0xc7   : > { %v3194_v26 = vpop.permute.xlu0 %1004  ;;  %4498 = vst [vmem:[#allocation35_spill] sm:$0xff] %v3196_v9 }
  0xc8   : > { %4497 = vst [vmem:[#allocation34_spill] sm:$0xff] %v3194_v26  ;;  %v4501_v26 = vmov 2  }
  0xc9   : > { %1363 = vperm.xlu1 %2551, %v3003_v62  }
  0xca   : > { %1576 = vperm.xlu0 %2553, %v3031_v4  }
  0xcd   : > { %1371 = vperm.xlu1 %2551, %v3017_v2  }
  0xce   : > { %1584 = vperm.xlu0 %2553, %v3045_v7  }
  0xd1   : > { %1379 = vperm.xlu1 %2551, %v3031_v4  }
  0xd2   : > { %1592 = vperm.xlu0 %2553, %v3059_v13  }
  0xd5   : > { %1387 = vperm.xlu1 %2551, %v3045_v7  }
  0xd6   : > { %2555 = vset.pattern.permute.xlu0 %v4499_v57 }
  0xd7   : > { %1074 = vperm.xlu0 %2555, %v2764_v1   ;;  %v3201_v53 = vpop.permute.xlu1 %1078 }
  0xd8   : > { %v3203_v59 = vpop.permute.xlu0 %1275 }
  0xd9   : > { %1395 = vperm.xlu1 %2551, %v3059_v13  }
  0xdb   : > { %1086 = vperm.xlu0 %2555, %v2780_v5   ;;  %v3207_v51 = vpop.permute.xlu1 %1082 }
  0xdc   : > { %v3209_v58 = vpop.permute.xlu0 %1287 }
  0xdd   : > { %4500 = vst [vmem:[#allocation36_spill] sm:$0xff] %v3209_v58  ;;  %2554 = vset.pattern.permute.xlu1 %v4501_v26 }
  0xde   : > { %1472 = vperm.xlu1 %2554, %v2796_v10  }
  0xdf   : > { %1094 = vperm.xlu0 %2555, %v2813_v12   ;;  %v3214_v9 = vpop.permute.xlu1 %1090 }
  0xe0   : > { %v3216_v47 = vpop.permute.xlu0 %1295 }
  0xe1   : > { %4502 = vst [vmem:[#allocation37_spill] sm:$0xff] %v3216_v47 }
  0xe2   : > { %1476 = vperm.xlu1 %2554, %v2759_v0  }
  0xe3   : > { %1102 = vperm.xlu0 %2555, %v2833_v18   ;;  %v3220_v56 = vpop.permute.xlu1 %1098 }
  0xe4   : > { %4503 = vst [vmem:[#allocation38_spill] sm:$0xff] %v3220_v56  ;;  %v3222_v44 = vpop.permute.xlu0 %1303 }
  0xe5   : > { %4504 = vst [vmem:[#allocation39_spill] sm:$0xff] %v3222_v44 }
  0xe6   : > { %1484 = vperm.xlu1 %2554, %v2820_v15  }
  0xe7   : > { %1110 = vperm.xlu0 %2555, %v2854_v24   ;;  %v3226_v26 = vpop.permute.xlu1 %1106 }
  0xe8   : > { %4505 = vst [vmem:[#allocation40_spill] sm:$0xff] %v3226_v26  ;;  %v3228_v52 = vpop.permute.xlu0 %1311 }
  0xe9   : > { %4506 = vst [vmem:[#allocation41_spill] sm:$0xff] %v3228_v52 }
  0xea   : > { %1492 = vperm.xlu1 %2554, %v2838_v19  }
  0xeb   : > { %1118 = vperm.xlu0 %2555, %v2876_v30   ;;  %v3232_v40 = vpop.permute.xlu1 %1114 }
  0xec   : > { %4507 = vst [vmem:[#allocation42_spill] sm:$0xff] %v3232_v40  ;;  %v3234_v50 = vpop.permute.xlu0 %1319 }
  0xed   : > { %4508 = vst [vmem:[#allocation43_spill] sm:$0xff] %v3234_v50 }
  0xee   : > { %1500 = vperm.xlu1 %2554, %v2860_v25  }
  0xef   : > { %1126 = vperm.xlu0 %2555, %v2898_v36   ;;  %v3238_v38 = vpop.permute.xlu1 %1122 }
  0xf0   : > { %4509 = vst [vmem:[#allocation44_spill] sm:$0xff] %v3238_v38  ;;  %v3240_v46 = vpop.permute.xlu0 %1327 }
  0xf1   : > { %4510 = vst [vmem:[#allocation45_spill] sm:$0xff] %v3240_v46 }
  0xf2   : > { %1508 = vperm.xlu1 %2554, %v2882_v31  }
  0xf3   : > { %1134 = vperm.xlu0 %2555, %v2920_v42   ;;  %v3244_v8 = vpop.permute.xlu1 %1130 }
  0xf4   : > { %4511 = vst [vmem:[#allocation46_spill] sm:$0xff] %v3244_v8  ;;  %v3246_v45 = vpop.permute.xlu0 %1335 }
  0xf5   : > { %4512 = vst [vmem:[#allocation47_spill] sm:$0xff] %v3246_v45 }
  0xf6   : > { %v3248_v33 = vpop.f32.mrb[0].mxu0  ;;  %1516 = vperm.xlu1 %2554, %v2904_v37  }
  0xf7   : > { %1142 = vperm.xlu0 %2555, %v2942_v48   ;;  %v3252_v50 = vpop.f32.mrb[0].mxu1  ;;  %v3254_v41 = vpop.permute.xlu1 %1138 }
  0xf8   : > { %4513 = vst [vmem:[#allocation48_spill] sm:$0xff] %v3252_v50  ;;  %4514 = vst [vmem:[#allocation49_spill] sm:$0xff] %v3254_v41  ;;  %v3256_v29 = vpop.permute.xlu0 %1343  ;;  %v3258_v46 = vpop.f32.mrb[1].mxu1 }
  0xf9   : > { %4515 = vst [vmem:[#allocation50_spill] sm:$0xff] %v3256_v29  ;;  %4516 = vst [vmem:[#allocation51_spill] sm:$0xff] %v3258_v46  ;;  %v3260_v38 = vpop.f32.mrb[1].mxu0 }
  0xfa   : > { %v3262_v52 = vpop.f32.mrb[2].mxu0  ;;  %1524 = vperm.xlu1 %2554, %v2926_v43  }
  0xfb   : > { %1150 = vperm.xlu0 %2555, %v2964_v54   ;;  %v3266_v45 = vpop.f32.mrb[3].mxu0  ;;  %v3268_v8 = vpop.f32.mrb[2].mxu1 }
  0xfc   : > { %4517 = vst [vmem:[#allocation52_spill] sm:$0xff] %v3268_v8  ;;  %v3270_v39 = vpop.permute.xlu1 %1146  ;;  %v3272_v50 = vpop.permute.xlu0 %1351 }
  0xfd   : > { %4518 = vst [vmem:[#allocation53_spill] sm:$0xff] %v3270_v39  ;;  %4519 = vst [vmem:[#allocation54_spill] sm:$0xff] %v3272_v50  ;;  %v3274_v41 = vpop.f32.mrb[3].mxu1 }
  0xfe   : > { %4520 = vst [vmem:[#allocation55_spill] sm:$0xff] %v3274_v41  ;;  %v3276_v29 = vpop.f32.mrb[4].mxu0  ;;  %1532 = vperm.xlu1 %2554, %v2948_v49  }
  0xff   : > { %1158 = vperm.xlu0 %2555, %v2986_v60   ;;  %v3280_v46 = vpop.f32.mrb[5].mxu0  ;;  %v3282_v27 = vpop.f32.mrb[4].mxu1 }
 0x100   : > { %4521 = vst [vmem:[#allocation56_spill] sm:$0xff] %v3282_v27  ;;  %v3284_v40 = vpop.permute.xlu1 %1154  ;;  %v3286_v8 = vpop.permute.xlu0 %1359 }
 0x101   : > { %4522 = vst [vmem:[#allocation57_spill] sm:$0xff] %v3284_v40  ;;  %4523 = vst [vmem:[#allocation58_spill] sm:$0xff] %v3286_v8  ;;  %v3288_v39 = vpop.f32.mrb[5].mxu1  ;;  %v3317_v8 = vld [vmem:[%s4447_s6] ss:$0 sm:$0xff] }
 0x102   : > { %4524 = vst [vmem:[#allocation59_spill] sm:$0xff] %v3288_v39  ;;  %v3290_v50 = vpop.f32.mrb[6].mxu0  ;;  %1540 = vperm.xlu1 %2554, %v2970_v55  }
 0x103   : > { %4525 = vst [vmem:[#allocation60_spill] sm:$0xff] %v3290_v50  ;;  %1166 = vperm.xlu0 %2555, %v3003_v62   ;;  %v3294_v41 = vpop.f32.mrb[7].mxu0  ;;  %v3296_v44 = vpop.f32.mrb[6].mxu1 }
 0x104   : > { %4526 = vst [vmem:[#allocation61_spill] sm:$0xff] %v3294_v41  ;;  %4527 = vst [vmem:[#allocation62_spill] sm:$0xff] %v3296_v44  ;;  %v3298_v35 = vpop.permute.xlu1 %1162  ;;  %v3300_v22 = vpop.permute.xlu0 %1367  ;;  %v722_v41 = vld [vmem:[%s3312_s10 + $0x10] sm:$0xff] }
 0x105   : > { %4528 = vst [vmem:[#allocation63_spill] sm:$0xff] %v3298_v35  ;;  %4529 = vst [vmem:[#allocation64_spill] sm:$0xff] %v3300_v22  ;;  %v3302_v27 = vpop.f32.mrb[7].mxu1  ;;  %v721_v35 = vld [vmem:[%s3312_s10 + $0x8] sm:$0xff] }
 0x106   : > { %4530 = vst [vmem:[#allocation65_spill] sm:$0xff] %v3302_v27  ;;  %v3304_v40 = vpop.f32.mrb[8].mxu0  ;;  %1548 = vperm.xlu1 %2554, %v2992_v61   ;;  %v753_v34 = vmax.f32 %v721_v35, 0.0  ;;  %v720_v35 = vld [vmem:[%s3312_s10] sm:$0xff] }
 0x107   : > { %4531 = vst [vmem:[#allocation66_spill] sm:$0xff] %v3304_v40  ;;  %1174 = vperm.xlu0 %2555, %v3017_v2   ;;  %v3320_v22 = vpop.f32.mrb[9].mxu0  ;;  %v2478_v27 = vpop.f32.mrb[8].mxu1 }
 0x108   : > { %4532 = vst [vmem:[#allocation67_spill] sm:$0xff] %v3320_v22  ;;  %v3324_v44 = vadd.f32 %v2478_v27, %v3317_v8  ;;  %v3326_v39 = vpop.permute.xlu1 %1170  ;;  %v3328_v26 = vpop.permute.xlu0 %1375  ;;  %v724_v27 = vld [vmem:[%s3312_s10 + $0x20] sm:$0xff]  ;;  %v3352_v56 = vmin.f32 %v753_v34, 1.0  ;;  %v752_v34 = vmax.f32 %v720_v35, 0.0 }
 0x109   : > { %4534 = vst [vmem:[#allocation69_spill] sm:$0xff] %v3326_v39  ;;  %4535 = vst [vmem:[#allocation70_spill] sm:$0xff] %v3328_v26  ;;  %v3330_v47 = vpop.f32.mrb[9].mxu1 }
 0x10a   : > { %4533 = vst [vmem:[#allocation68_spill] sm:$0xff] %v3324_v44  ;;  %4536 = vst [vmem:[#allocation71_spill] sm:$0xff] %v3330_v47  ;;  %v3332_v40 = vpop.f32.mrb[10].mxu0  ;;  %1556 = vperm.xlu1 %2554, %v3008_v63   ;;  %vm849_vm1 = vcmp.gt.f32.partialorder %v3352_v56, 0.05  ;;  %v3392_v32 = vmin.f32 %v752_v34, 1.0 }
 0x10b   : > { %4537 = vst [vmem:[#allocation72_spill] sm:$0xff] %v3332_v40  ;;  %1182 = vperm.xlu0 %2555, %v3031_v4   ;;  %v3336_v22 = vpop.f32.mrb[11].mxu0  ;;  %v2481_v20 = vpop.f32.mrb[10].mxu1  ;;  %4544 = vst [vmem:[#allocation79_spill] sm:$0xff] %v3352_v56  ;;  %v725_v56 = vld [vmem:[%s3312_s10 + $0x28] sm:$0xff] }
 0x10c   : > { %4538 = vst [vmem:[#allocation73_spill] sm:$0xff] %v3336_v22  ;;  %v3340_v44 = vadd.f32 %v2481_v20, %v3317_v8  ;;  %v3342_v39 = vpop.permute.xlu1 %1178  ;;  %v3344_v26 = vpop.permute.xlu0 %1383  ;;  %v756_v22 = vmax.f32 %v724_v27, 0.0  ;;  %vm848_vm3 = vcmp.gt.f32.partialorder %v3392_v32, 0.05 }
 0x10d   : > { %4540 = vst [vmem:[#allocation75_spill] sm:$0xff] %v3342_v39  ;;  %4541 = vst [vmem:[#allocation76_spill] sm:$0xff] %v3344_v26  ;;  %v3346_v47 = vpop.f32.mrb[11].mxu1 }
 0x10e   : > { %4539 = vst [vmem:[#allocation74_spill] sm:$0xff] %v3340_v44  ;;  %4542 = vst [vmem:[#allocation77_spill] sm:$0xff] %v3346_v47  ;;  %v3348_v40 = vpop.f32.mrb[12].mxu0  ;;  %1564 = vperm.xlu1 %2554, %v3022_v3   ;;  %v726_v44 = vld [vmem:[%s3312_s10 + $0x30] sm:$0xff]  ;;  %v3372_v27 = vmin.f32 %v756_v22, 1.0  ;;  %v881_v22 = vsel %vm849_vm1, %v2796_v10, 0.0 }
 0x10f   : > { %4543 = vst [vmem:[#allocation78_spill] sm:$0xff] %v3348_v40  ;;  %1190 = vperm.xlu0 %2555, %v3045_v7   ;;  %v3355_v58 = vpop.f32.mrb[13].mxu0  ;;  %v2484_v20 = vpop.f32.mrb[12].mxu1 }
 0x110   : > { %4545 = vst [vmem:[#allocation80_spill] sm:$0xff] %v3355_v58  ;;  %v3359_v39 = vadd.f32 %v2484_v20, %v3317_v8  ;;  %v3361_v26 = vpop.permute.xlu1 %1186  ;;  %v3363_v47 = vpop.permute.xlu0 %1391  ;;  %v758_v58 = vmax.f32 %v726_v44, 0.0  ;;  %vm852_vm2 = vcmp.gt.f32.partialorder %v3372_v27, 0.05 }
 0x111   : > { %4547 = vst [vmem:[#allocation82_spill] sm:$0xff] %v3361_v26  ;;  %4548 = vst [vmem:[#allocation83_spill] sm:$0xff] %v3363_v47  ;;  %v3365_v40 = vpop.f32.mrb[13].mxu1  ;;  %v884_v10 = vsel %vm852_vm2, %v2820_v15, 0.0 }
 0x112   : > { %4546 = vst [vmem:[#allocation81_spill] sm:$0xff] %v3359_v39  ;;  %4549 = vst [vmem:[#allocation84_spill] sm:$0xff] %v3365_v40  ;;  %v3368_v50 = vpop.f32.mrb[14].mxu0  ;;  %1572 = vperm.xlu1 %2554, %v3036_v6   ;;  %v728_v39 = vld [vmem:[%s3312_s10 + $0x40] sm:$0xff] }
 0x113   : > { %4550 = vst [vmem:[#allocation85_spill] sm:$0xff] %v3368_v50  ;;  %1198 = vperm.xlu0 %2555, %v3059_v13   ;;  %v3375_v20 = vpop.f32.mrb[15].mxu0  ;;  %v2487_v47 = vpop.f32.mrb[14].mxu1  ;;  %v754_v50 = vmax.f32 %v722_v41, 0.0 }
 0x114   : > { %4551 = vst [vmem:[#allocation86_spill] sm:$0xff] %v3375_v20  ;;  %v3379_v40 = vadd.f32 %v2487_v47, %v3317_v8  ;;  %v3381_v35 = vpop.permute.xlu1 %1194  ;;  %v3383_v26 = vpop.f32.mrb[15].mxu1  ;;  %v723_v20 = vld [vmem:[%s3312_s10 + $0x18] sm:$0xff]  ;;  %v3395_v47 = vmin.f32 %v758_v58, 1.0 }
 0x115   : > { %4553 = vst [vmem:[#allocation88_spill] sm:$0xff] %v3381_v35  ;;  %4554 = vst [vmem:[#allocation89_spill] sm:$0xff] %v3383_v26  ;;  %v3388_v44 = vpop.permute.xlu0 %1468  ;;  %v730_v26 = vld [vmem:[%s3312_s10 + $0x50] sm:$0xff]  ;;  %v755_v34 = vmax.f32 %v723_v20, 0.0  ;;  %v880_v20 = vsel %vm848_vm3, %v2764_v1, 0.0 }
 0x116   : > { %4552 = vst [vmem:[#allocation87_spill] sm:$0xff] %v3379_v40  ;;  %4555 = vst [vmem:[#allocation90_spill] sm:$0xff] %v3388_v44  ;;  %1580 = vperm.xlu1 %2554, %v3050_v11   ;;  %v760_v40 = vmax.f32 %v728_v39, 0.0  ;;  %v3405_v44 = vmin.f32 %v754_v50, 1.0  ;;  %vm854_vm4 = vcmp.gt.f32.partialorder %v3395_v47, 0.05 }
 0x117   : > { %1671 = vperm.xlu0 %2555, %v881_v22   ;;  %v762_v58 = vmax.f32 %v730_v26, 0.0  ;;  %v732_v22 = vld [vmem:[%s3312_s10 + $0x60] sm:$0xff]  ;;  %v886_v50 = vsel %vm854_vm4, %v2838_v19, 0.0  ;;  %v727_v26 = vld [vmem:[%s3312_s10 + $0x38] sm:$0xff]  ;;  %v734_v1 = vld [vmem:[%s3312_s10 + $0x70] sm:$0xff] }
 0x118   : > { %v3398_v35 = vpop.permute.xlu1 %1271  ;;  %v3411_v39 = vmin.f32 %v760_v40, 1.0  ;;  %v757_v40 = vmax.f32 %v725_v56, 0.0  ;;  %vm850_vm5 = vcmp.gt.f32.partialorder %v3405_v44, 0.05  ;;  %v764_v19 = vmax.f32 %v732_v22, 0.0  ;;  %v729_v22 = vld [vmem:[%s3312_s10 + $0x48] sm:$0xff] }
 0x119   : > { %4556 = vst [vmem:[#allocation91_spill] sm:$0xff] %v3398_v35  ;;  %v3403_v41 = vpop.permute.xlu0 %1480  ;;  %v3424_v35 = vmin.f32 %v755_v34, 1.0  ;;  %v1042_v32 = vsel %vm850_vm5, %v3096_v16, 0.0  ;;  %v577_v44 = vadd.f32 %v3262_v52, %v3317_v8  ;;  %v572_v52 = vadd.f32 %v3317_v8, %v3266_v45 }
 0x11a   : > { %4557 = vst [vmem:[#allocation92_spill] sm:$0xff] %v3403_v41  ;;  %1588 = vperm.xlu1 %2554, %v3064_v14   ;;  %vm856_vm6 = vcmp.gt.f32.partialorder %v3411_v39, 0.05  ;;  %v4586_v39 = vld [vmem:[#allocation36_spill] sm:$0xff] }
 0x11b   : > { %1686 = vperm.xlu0 %2555, %v884_v10   ;;  %v3430_v10 = vmin.f32 %v762_v58, 1.0  ;;  %v888_v56 = vsel %vm856_vm6, %v2860_v25, 0.0  ;;  %v759_v58 = vmax.f32 %v727_v26, 0.0  ;;  %vm851_vm7 = vcmp.gt.f32.partialorder %v3424_v35, 0.05  ;;  %v736_v25 = vld [vmem:[%s3312_s10 + $0x80] sm:$0xff] }
 0x11c   : > { %v3414_v15 = vpop.permute.xlu1 %1279 }
 0x11d   : > { %v3422_v41 = vpop.permute.xlu0 %1488  ;;  %vm858_vm8 = vcmp.gt.f32.partialorder %v3430_v10, 0.05  ;;  %v4592_v10 = vld [vmem:[#allocation37_spill] sm:$0xff] }
 0x11e   : > { %4558 = vst [vmem:[#allocation93_spill] sm:$0xff] %v3422_v41  ;;  %2556 = vset.pattern.permute.xlu1 %v4499_v57  ;;  %v882_v57 = vsel %vm850_vm5, %v2759_v0, 0.0  ;;  %v3443_v41 = vmin.f32 %v757_v40, 1.0  ;;  %v890_v0 = vsel %vm858_vm8, %v2882_v31, 0.0  ;;  %v883_v40 = vsel %vm851_vm7, %v2780_v5, 0.0  ;;  %v738_v31 = vld [vmem:[%s3312_s10 + $0x90] sm:$0xff] }
 0x11f   : > { %1696 = vperm.xlu0 %2555, %v886_v50   ;;  %1666 = vperm.xlu1 %2556, %v880_v20   ;;  %v3448_v50 = vmin.f32 %v764_v19, 1.0  ;;  %v766_v20 = vmax.f32 %v734_v1, 0.0  ;;  %v761_v19 = vmax.f32 %v729_v22, 0.0  ;;  %v731_v1 = vld [vmem:[%s3312_s10 + $0x58] sm:$0xff] }
 0x120   : > { %v3433_v21 = vpop.permute.xlu1 %1283  ;;  %vm853_vm9 = vcmp.gt.f32.partialorder %v3443_v41, 0.05 }
 0x121   : > { %4559 = vst [vmem:[#allocation94_spill] sm:$0xff] %v3433_v21  ;;  %v3441_v34 = vpop.permute.xlu0 %1496  ;;  %vm860_vm10 = vcmp.gt.f32.partialorder %v3448_v50, 0.05  ;;  %v4598_v50 = vld [vmem:[#allocation39_spill] sm:$0xff] }
 0x122   : > { %4560 = vst [vmem:[#allocation95_spill] sm:$0xff] %v3441_v34  ;;  %v3461_v34 = vmin.f32 %v759_v58, 1.0  ;;  %v892_v5 = vsel %vm860_vm10, %v2904_v37, 0.0  ;;  %v885_v58 = vsel %vm853_vm9, %v2813_v12, 0.0  ;;  %v733_v37 = vld [vmem:[%s3312_s10 + $0x68] sm:$0xff] }
 0x123   : > { %1706 = vperm.xlu0 %2555, %v888_v56   ;;  %1676 = vperm.xlu1 %2556, %v882_v57   ;;  %v3466_v56 = vmin.f32 %v766_v20, 1.0  ;;  %v768_v57 = vmax.f32 %v736_v25, 0.0  ;;  %v3479_v20 = vmin.f32 %v761_v19, 1.0  ;;  %v763_v25 = vmax.f32 %v731_v1, 0.0 }
 0x124   : > { %v3451_v21 = vpop.permute.xlu1 %1291  ;;  %vm855_vm11 = vcmp.gt.f32.partialorder %v3461_v34, 0.05 }
 0x125   : > { %4561 = vst [vmem:[#allocation96_spill] sm:$0xff] %v3451_v21  ;;  %v3459_v26 = vpop.permute.xlu0 %1504  ;;  %vm862_vm12 = vcmp.gt.f32.partialorder %v3466_v56, 0.05  ;;  %v887_v19 = vsel %vm855_vm11, %v2833_v18, 0.0  ;;  %vm4456_vm13 = vcmp.gt.f32.partialorder %v3479_v20, 0.05 }
 0x126   : > { %4562 = vst [vmem:[#allocation97_spill] sm:$0xff] %v3459_v26  ;;  %v740_v26 = vld [vmem:[%s3312_s10 + $0xa0] sm:$0xff]  ;;  %v894_v12 = vsel %vm862_vm12, %v2926_v43, 0.0  ;;  %v742_v43 = vld [vmem:[%s3312_s10 + $0xb0] sm:$0xff]  ;;  %v4604_v56 = vld [vmem:[#allocation41_spill] sm:$0xff] }
 0x127   : > { %1716 = vperm.xlu0 %2555, %v890_v0   ;;  %1681 = vperm.xlu1 %2556, %v883_v40   ;;  %v3483_v0 = vmin.f32 %v768_v57, 1.0  ;;  %v770_v40 = vmax.f32 %v738_v31, 0.0  ;;  %v3498_v57 = vmin.f32 %v763_v25, 1.0  ;;  %v765_v31 = vmax.f32 %v733_v37, 0.0 }
 0x128   : > { %v3469_v21 = vpop.permute.xlu1 %1299  ;;  %v889_v25 = vsel %vm4456_vm13, %v2854_v24, 0.0 }
 0x129   : > { %4563 = vst [vmem:[#allocation98_spill] sm:$0xff] %v3469_v21  ;;  %v3477_v22 = vpop.permute.xlu0 %1512  ;;  %vm4455_vm14 = vcmp.gt.f32.partialorder %v3483_v0, 0.05  ;;  %vm4458_vm15 = vcmp.gt.f32.partialorder %v3498_v57, 0.05 }
 0x12a   : > { %4564 = vst [vmem:[#allocation99_spill] sm:$0xff] %v3477_v22  ;;  %v772_v22 = vmax.f32 %v740_v26, 0.0  ;;  %v896_v18 = vsel %vm4455_vm14, %v2948_v49, 0.0  ;;  %v744_v49 = vld [vmem:[%s3312_s10 + $0xc0] sm:$0xff] }
 0x12b   : > { %1726 = vperm.xlu0 %2555, %v892_v5   ;;  %1691 = vperm.xlu1 %2556, %v885_v58   ;;  %v735_v5 = vld [vmem:[%s3312_s10 + $0x78] sm:$0xff]  ;;  %v3502_v58 = vmin.f32 %v770_v40, 1.0  ;;  %v3516_v40 = vmin.f32 %v765_v31, 1.0  ;;  %v891_v31 = vsel %vm4458_vm15, %v2876_v30, 0.0 }
 0x12c   : > { %v3487_v21 = vpop.permute.xlu1 %1307  ;;  %v767_v26 = vmax.f32 %v735_v5, 0.0 }
 0x12d   : > { %4565 = vst [vmem:[#allocation100_spill] sm:$0xff] %v3487_v21  ;;  %v3495_v1 = vpop.permute.xlu0 %1520  ;;  %vm4457_vm0 = vcmp.gt.f32.partialorder %v3502_v58, 0.05  ;;  %vm4460_vm14 = vcmp.gt.f32.partialorder %v3516_v40, 0.05 }
 0x12e   : > { %4566 = vst [vmem:[#allocation101_spill] sm:$0xff] %v3495_v1  ;;  %v774_v1 = vmax.f32 %v742_v43, 0.0  ;;  %v898_v24 = vsel %vm4457_vm0, %v2970_v55, 0.0  ;;  %v739_v43 = vld [vmem:[%s3312_s10 + $0x98] sm:$0xff]  ;;  %v746_v55 = vld [vmem:[%s3312_s10 + $0xd0] sm:$0xff] }
 0x12f   : > { %1736 = vperm.xlu0 %2555, %v894_v12   ;;  %1701 = vperm.xlu1 %2556, %v887_v19   ;;  %v737_v12 = vld [vmem:[%s3312_s10 + $0x88] sm:$0xff]  ;;  %v3520_v19 = vmin.f32 %v772_v22, 1.0 }
 0x130   : > { %v3505_v21 = vpop.permute.xlu1 %1315  ;;  %v769_v22 = vmax.f32 %v737_v12, 0.0 }
 0x131   : > { %4567 = vst [vmem:[#allocation102_spill] sm:$0xff] %v3505_v21  ;;  %v3513_v37 = vpop.permute.xlu0 %1528  ;;  %vm4459_vm13 = vcmp.gt.f32.partialorder %v3520_v19, 0.05 }
 0x132   : > { %4568 = vst [vmem:[#allocation103_spill] sm:$0xff] %v3513_v37  ;;  %v3533_v37 = vmin.f32 %v767_v26, 1.0  ;;  %v900_v30 = vsel %vm4459_vm13, %v2992_v61, 0.0  ;;  %v893_v26 = vsel %vm4460_vm14, %v2898_v36, 0.0  ;;  %v741_v61 = vld [vmem:[%s3312_s10 + $0xa8] sm:$0xff] }
 0x133   : > { %1746 = vperm.xlu0 %2555, %v896_v18   ;;  %1711 = vperm.xlu1 %2556, %v889_v25   ;;  %v3538_v18 = vmin.f32 %v774_v1, 1.0  ;;  %v776_v25 = vmax.f32 %v744_v49, 0.0  ;;  %v3551_v1 = vmin.f32 %v769_v22, 1.0  ;;  %v771_v49 = vmax.f32 %v739_v43, 0.0 }
 0x134   : > { %v3523_v21 = vpop.permute.xlu1 %1323  ;;  %vm4462_vm0 = vcmp.gt.f32.partialorder %v3533_v37, 0.05 }
 0x135   : > { %4569 = vst [vmem:[#allocation104_spill] sm:$0xff] %v3523_v21  ;;  %v3531_v5 = vpop.permute.xlu0 %1536  ;;  %vm4461_vm15 = vcmp.gt.f32.partialorder %v3538_v18, 0.05  ;;  %v895_v22 = vsel %vm4462_vm0, %v2920_v42, 0.0  ;;  %vm4464_vm13 = vcmp.gt.f32.partialorder %v3551_v1, 0.05 }
 0x136   : > { %4570 = vst [vmem:[#allocation105_spill] sm:$0xff] %v3531_v5  ;;  %v748_v5 = vld [vmem:[%s3312_s10 + $0xe0] sm:$0xff]  ;;  %v902_v36 = vsel %vm4461_vm15, %v3008_v63, 0.0  ;;  %v750_v63 = vld [vmem:[%s3312_s10 + $0xf0] sm:$0xff] }
 0x137   : > { %1756 = vperm.xlu0 %2555, %v898_v24   ;;  %1721 = vperm.xlu1 %2556, %v891_v31   ;;  %v3555_v24 = vmin.f32 %v776_v25, 1.0  ;;  %v778_v31 = vmax.f32 %v746_v55, 0.0  ;;  %v3570_v25 = vmin.f32 %v771_v49, 1.0  ;;  %v773_v55 = vmax.f32 %v741_v61, 0.0 }
 0x138   : > { %v3541_v21 = vpop.permute.xlu1 %1331  ;;  %v897_v49 = vsel %vm4464_vm13, %v2942_v48, 0.0 }
 0x139   : > { %4571 = vst [vmem:[#allocation106_spill] sm:$0xff] %v3541_v21  ;;  %v3549_v12 = vpop.permute.xlu0 %1544  ;;  %vm4463_vm14 = vcmp.gt.f32.partialorder %v3555_v24, 0.05  ;;  %vm4466_vm15 = vcmp.gt.f32.partialorder %v3570_v25, 0.05 }
 0x13a   : > { %4572 = vst [vmem:[#allocation107_spill] sm:$0xff] %v3549_v12  ;;  %v780_v12 = vmax.f32 %v748_v5, 0.0  ;;  %v904_v42 = vsel %vm4463_vm14, %v3022_v3, 0.0  ;;  %v3588_v5 = vmin.f32 %v773_v55, 1.0  ;;  %v745_v3 = vld [vmem:[%s3312_s10 + $0xc8] sm:$0xff]  ;;  %v899_v55 = vsel %vm4466_vm15, %v2964_v54, 0.0 }
 0x13b   : > { %1766 = vperm.xlu0 %2555, %v900_v30   ;;  %1731 = vperm.xlu1 %2556, %v893_v26   ;;  %v743_v30 = vld [vmem:[%s3312_s10 + $0xb8] sm:$0xff]  ;;  %v3574_v26 = vmin.f32 %v778_v31, 1.0 }
 0x13c   : > { %v3559_v21 = vpop.permute.xlu1 %1339  ;;  %v775_v31 = vmax.f32 %v743_v30, 0.0  ;;  %vm869_vm14 = vcmp.gt.f32.partialorder %v3588_v5, 0.05 }
 0x13d   : > { %4573 = vst [vmem:[#allocation108_spill] sm:$0xff] %v3559_v21  ;;  %v3567_v43 = vpop.permute.xlu0 %1552  ;;  %vm4465_vm0 = vcmp.gt.f32.partialorder %v3574_v26, 0.05 }
 0x13e   : > { %4574 = vst [vmem:[#allocation109_spill] sm:$0xff] %v3567_v43  ;;  %v906_v48 = vsel %vm4465_vm0, %v3036_v6, 0.0 }
 0x13f   : > { %1776 = vperm.xlu0 %2555, %v902_v36   ;;  %1741 = vperm.xlu1 %2556, %v895_v22   ;;  %v3591_v36 = vmin.f32 %v780_v12, 1.0  ;;  %v782_v22 = vmax.f32 %v750_v63, 0.0  ;;  %v777_v12 = vmax.f32 %v745_v3, 0.0 }
 0x140   : > { %v3577_v21 = vpop.permute.xlu1 %1347 }
 0x141   : > { %v3585_v61 = vpop.permute.xlu0 %1560  ;;  %vm4467_vm13 = vcmp.gt.f32.partialorder %v3591_v36, 0.05  ;;  %v3608_v63 = vmin.f32 %v782_v22, 1.0  ;;  %v3622_v22 = vmin.f32 %v777_v12, 1.0 }
 0x142   : > { %4575 = vst [vmem:[#allocation110_spill] sm:$0xff] %v3585_v61  ;;  %v3604_v61 = vmin.f32 %v775_v31, 1.0  ;;  %v908_v54 = vsel %vm4467_vm13, %v3050_v11, 0.0 }
 0x143   : > { %1786 = vperm.xlu0 %2555, %v904_v42   ;;  %1751 = vperm.xlu1 %2556, %v897_v49   ;;  %v747_v42 = vld [vmem:[%s3312_s10 + $0xd8] sm:$0xff]  ;;  %v901_v49 = vsel %vm869_vm14, %v2986_v60, 0.0  ;;  %vm4468_vm15 = vcmp.gt.f32.partialorder %v3608_v63, 0.05  ;;  %vm873_vm13 = vcmp.gt.f32.partialorder %v3622_v22, 0.05 }
 0x144   : > { %v3594_v43 = vpop.permute.xlu1 %1355  ;;  %vm871_vm0 = vcmp.gt.f32.partialorder %v3604_v61, 0.05  ;;  %v779_v3 = vmax.f32 %v747_v42, 0.0  ;;  %v910_v11 = vsel %vm4468_vm15, %v3064_v14, 0.0  ;;  %v905_v14 = vsel %vm873_vm13, %v3017_v2, 0.0 }
 0x145   : > { %v3602_v30 = vpop.permute.xlu0 %1568  ;;  %v903_v60 = vsel %vm871_vm0, %v3003_v62, 0.0  ;;  %v1040_v62 = vsel %vm848_vm3, %v3098_v17, 0.0  ;;  %v3661_v2 = vld [vmem:[%s4446_s5 + $0x20] ss:$0 sm:$0xff]  ;;  %v562_v17 = vadd.f32 %v3317_v8, %v3260_v38 }
 0x146   : > { %4576 = vst [vmem:[#allocation111_spill] sm:$0xff] %v3602_v30  ;;  %v3637_v12 = vmin.f32 %v779_v3, 1.0  ;;  %v1207_v27 = vmul.f32 %v3661_v2, %v3207_v51 }
 0x147   : > { %1796 = vperm.xlu0 %2555, %v906_v48   ;;  %1761 = vperm.xlu1 %2556, %v899_v55   ;;  %v749_v48 = vld [vmem:[%s3312_s10 + $0xe8] sm:$0xff] }
 0x148   : > { %v3611_v6 = vpop.permute.xlu1 %1363  ;;  %v781_v42 = vmax.f32 %v749_v48, 0.0  ;;  %vm875_vm15 = vcmp.gt.f32.partialorder %v3637_v12, 0.05 }
 0x149   : > { %4577 = vst [vmem:[#allocation112_spill] sm:$0xff] %v3611_v6  ;;  %v3619_v31 = vpop.permute.xlu0 %1576 }
 0x14a   : > { %4578 = vst [vmem:[#allocation113_spill] sm:$0xff] %v3619_v31  ;;  %v3651_v3 = vmin.f32 %v781_v42, 1.0  ;;  %v567_v42 = vadd.f32 %v3248_v33, %v3317_v8  ;;  %v3684_v33 = vld [vmem:[%s4446_s5 + $0x21] ss:$0 sm:$0xff] }
 0x14b   : > { %1806 = vperm.xlu0 %2555, %v908_v54   ;;  %1771 = vperm.xlu1 %2556, %v901_v49   ;;  %v751_v54 = vld [vmem:[%s3312_s10 + $0xf8] sm:$0xff]  ;;  %s339_s10 = scalar_lea.vmem [#allocation4], %s2334_s22  ;;  %s2182_s22 = scalar_lea.sflag [#allocation5], %s4030_s19 }
 0x14c   : > { %v3626_v55 = vpop.permute.xlu1 %1371  ;;  %v783_v48 = vmax.f32 %v751_v54, 0.0  ;;  %vm877_vm3 = vcmp.gt.f32.partialorder %v3651_v3, 0.05  ;;  %s2211_s20 = sshll.u32 %s339_s10, 4  ;;  %s4055_s20 = int_to_ptr.vmem [resolvable:$true] %s2211_s20 }
 0x14d   : > { %4579 = vst [vmem:[#allocation114_spill] sm:$0xff] %v3626_v55  ;;  %v3634_v31 = vpop.permute.xlu0 %1584  ;;  %v909_v16 = vsel %vm877_vm3, %v3045_v7, 0.0  ;;  %s2559_s21 = scalar_lea.vmem %s4055_s20, 512  ;;  %p2566_p0 = scmp.lt.s32.totalorder %s4055_s20, %s2564_s25 }
 0x14e   : > { %p2560_p11 = scmp.ne.s32.totalorder %s4055_s20, %s2559_s21  ;;  %p2567_p1 = scmp.lt.s32.totalorder %s2565_s23, %s2559_s21 }
 0x14f   : > { %1816 = vperm.xlu0 %2555, %v910_v11   ;;  %1781 = vperm.xlu1 %2556, %v903_v60   ;;  %v907_v60 = vsel %vm875_vm15, %v3031_v4, 0.0 }
 0x150   : > { %v3640_v49 = vpop.permute.xlu1 %1379  ;;  %p2561_p12 = pnand %p2560_p11, %p2746_p5  ;;  %p2568_p2 = por %p2567_p1, %p2566_p0 }
 0x151   : > { %4580 = vst [vmem:[#allocation115_spill] sm:$0xff] %v3640_v49  ;;  %v3645_v30 = vpop.permute.xlu0 %1592  ;;  %v4583_v49 = vld [vmem:[#allocation13_spill] sm:$0xff] }
 0x152   : > { %p2562_p13 = pneg %p2561_p12 }
 0x153   : > { %1895 = vperm.xlu0 %2555, %v1040_v62   ;;  %1791 = vperm.xlu1 %2556, %v905_v14   ;;  %v3671_v14 = vmin.f32 %v783_v48, 1.0  ;;  %v1206_v62 = vmul.f32 %v3661_v2, %v3201_v53  ;;  %v1044_v53 = vsel %vm852_vm2, %v3110_v23, 0.0  ;;  %v1046_v23 = vsel %vm854_vm4, %v3117_v28, 0.0 }
 0x154   : > { %v3653_v11 = vpop.permute.xlu1 %1387  ;;  %v1404_v28 = vmul.f32 %v3684_v33, %v3414_v15  ;;  %v1048_v15 = vsel %vm856_vm6, %v4583_v49, 0.0  ;;  %v1406_v49 = vmul.f32 %v3684_v33, %v4586_v39  ;;  %vm4609_vm2 = vcmp.gt.f32.partialorder %v3483_v0, 0.05  ;;  %v4612_v0 = vld [vmem:[#allocation14_spill] sm:$0xff]  ;;  %p2569_p3 = pnand %p2568_p2, %p2562_p13 }
 0x155   : > { %vm879_vm5 = vcmp.gt.f32.partialorder %v3671_v14, 0.05  ;;  %vm4613_vm4 = vcmp.gt.f32.partialorder %v3498_v57, 0.05  ;;  %vm4620_vm6 = vcmp.gt.f32.partialorder %v3502_v58, 0.05 }
 0x156   : > { %v1075_v54 = vpop.permute.xlu0 %1074  ;;  %v4624_v58 = vld [vmem:[#allocation24_spill] sm:$0xff] }
 0x157   : > { %v1205_v4 = vmul.f32 %v3661_v2, %v1075_v54  ;;  %1905 = vperm.xlu0 %2555, %v1042_v32   ;;  %1801 = vperm.xlu1 %2556, %v907_v60   ;;  %v1238_v60 = vadd.f32 %v1206_v62, %v567_v42  ;;  %v1403_v54 = vmul.f32 %v3684_v33, %v3203_v59  ;;  %v3712_v59 = vld [vmem:[%s4446_s5 + $0x22] ss:$0 sm:$0xff] }
 0x158   : > { %v3676_v38 = vpop.permute.xlu1 %1395  ;;  %v587_v42 = vadd.f32 %v3276_v29, %v3317_v8  ;;  %v1628_v22 = vmul.f32 %v3712_v59, %v3634_v31  ;;  %v2161_v14 = vld [vmem:[%s4445_s4] sm:$0xff] }
 0x159   : > { %v3688_v48 = vadd.f32 %v1205_v4, %v562_v17  ;;  %v911_v17 = vsel %vm879_vm5, %v3059_v13, 0.0  ;;  %v582_v13 = vadd.f32 %v3317_v8, %v3280_v46  ;;  %v1435_v47 = vadd.f32 %v1403_v54, %v1238_v60  ;;  %v4584_v60 = vld [vmem:[#allocation60_spill] sm:$0xff] }
 0x15a   : > { %v1087_v32 = vpop.permute.xlu0 %1086  ;;  %v597_v54 = vadd.f32 %v4584_v60, %v3317_v8 }
 0x15b   : > { %v1208_v7 = vmul.f32 %v3661_v2, %v1087_v32  ;;  %1915 = vperm.xlu0 %2555, %v1044_v53   ;;  %1811 = vperm.xlu1 %2556, %v909_v16   ;;  %v1209_v16 = vmul.f32 %v3661_v2, %v3214_v9  ;;  %v4581_v32 = vld [vmem:[#allocation9_spill] sm:$0xff] }
 0x15c   : > { %v1041_v46 = vsel %vm849_vm1, %v4581_v32, 0.0  ;;  %v4587_v32 = vld [vmem:[#allocation38_spill] sm:$0xff]  ;;  %vm4607_vm1 = vcmp.gt.f32.partialorder %v3479_v20, 0.05 }
 0x15d   : > { %v3714_v45 = vadd.f32 %v1208_v7, %v577_v44  ;;  %v1473_v4 = vpop.permute.xlu1 %1472  ;;  %v1239_v44 = vadd.f32 %v1207_v27, %v572_v52  ;;  %v4590_v7 = vld [vmem:[#allocation66_spill] sm:$0xff] }
 0x15e   : > { %v1600_v51 = vmul.f32 %v3712_v59, %v1473_v4  ;;  %v1095_v62 = vpop.permute.xlu0 %1094 }
 0x15f   : > { %v1210_v29 = vmul.f32 %v3661_v2, %v1095_v62  ;;  %1925 = vperm.xlu0 %2555, %v1046_v23   ;;  %1821 = vperm.xlu1 %2556, %v911_v17   ;;  %v1241_v23 = vadd.f32 %v1209_v16, %v582_v13  ;;  %v4585_v62 = vld [vmem:[#allocation61_spill] sm:$0xff]  ;;  %v1436_v52 = vadd.f32 %v1404_v28, %v1239_v44  ;;  %v4588_v13 = vld [vmem:[#allocation8_spill] sm:$0xff]  ;;  %v4589_v28 = vld [vmem:[#allocation15_spill] sm:$0xff] }
 0x160   : > { %v3724_v53 = vadd.f32 %v1600_v51, %v1435_v47  ;;  %v592_v9 = vadd.f32 %v3317_v8, %v4585_v62  ;;  %v1043_v16 = vsel %vm851_vm7, %v4588_v13, 0.0  ;;  %v1050_v44 = vsel %vm858_vm8, %v4589_v28, 0.0  ;;  %v4591_v62 = vld [vmem:[#allocation67_spill] sm:$0xff]  ;;  %v4593_v13 = vld [vmem:[#allocation40_spill] sm:$0xff] }
 0x161   : > { %v3734_v4 = vadd.f32 %v1210_v29, %v587_v42  ;;  %v1477_v17 = vpop.permute.xlu1 %1476  ;;  %v1211_v42 = vmul.f32 %v3661_v2, %v4587_v32  ;;  %v1408_v32 = vmul.f32 %v3684_v33, %v4592_v10  ;;  %v4596_v28 = vld [vmem:[#allocation72_spill] sm:$0xff]  ;;  %vm4622_vm7 = vcmp.gt.f32.partialorder %v3516_v40, 0.05 }
 0x162   : > { %v1601_v27 = vmul.f32 %v3712_v59, %v1477_v17  ;;  %v1103_v47 = vpop.permute.xlu0 %1102  ;;  %vm4625_vm8 = vcmp.gt.f32.partialorder %v3520_v19, 0.05 }
 0x163   : > { %v1212_v51 = vmul.f32 %v3661_v2, %v1103_v47  ;;  %1935 = vperm.xlu0 %2555, %v1048_v15   ;;  %1900 = vperm.xlu1 %2556, %v1041_v46   ;;  %v607_v15 = vadd.f32 %v4590_v7, %v3317_v8  ;;  %v1243_v17 = vadd.f32 %v1211_v42, %v592_v9  ;;  %v4594_v9 = vld [vmem:[#allocation10_spill] sm:$0xff] }
 0x164   : > { %v3744_v29 = vadd.f32 %v1601_v27, %v1436_v52  ;;  %v602_v47 = vadd.f32 %v3317_v8, %v4591_v62  ;;  %v1438_v52 = vadd.f32 %v1406_v49, %v1241_v23  ;;  %v1045_v42 = vsel %vm853_vm9, %v4594_v9, 0.0  ;;  %v4595_v23 = vld [vmem:[#allocation17_spill] sm:$0xff]  ;;  %v4599_v9 = vld [vmem:[#allocation42_spill] sm:$0xff] }
 0x165   : > { %v3754_v46 = vadd.f32 %v1212_v51, %v597_v54  ;;  %v1485_v60 = vpop.permute.xlu1 %1484  ;;  %v1213_v54 = vmul.f32 %v3661_v2, %v4593_v13  ;;  %v1052_v49 = vsel %vm860_vm10, %v4595_v23, 0.0  ;;  %v4597_v62 = vld [vmem:[#allocation73_spill] sm:$0xff]  ;;  %v1410_v13 = vmul.f32 %v3684_v33, %v4598_v50  ;;  %v4602_v23 = vld [vmem:[#allocation78_spill] sm:$0xff] }
 0x166   : > { %v1603_v27 = vmul.f32 %v3712_v59, %v1485_v60  ;;  %v1111_v39 = vpop.permute.xlu0 %1110  ;;  %vm4630_vm9 = vcmp.gt.f32.partialorder %v3533_v37, 0.05  ;;  %vm4636_vm10 = vcmp.gt.f32.partialorder %v3538_v18, 0.05  ;;  %v4640_v18 = vld [vmem:[#allocation28_spill] sm:$0xff] }
 0x167   : > { %v1214_v35 = vmul.f32 %v3661_v2, %v1111_v39  ;;  %1945 = vperm.xlu0 %2555, %v1050_v44   ;;  %1910 = vperm.xlu1 %2556, %v1043_v16   ;;  %v617_v44 = vadd.f32 %v4596_v28, %v3317_v8  ;;  %v1245_v60 = vadd.f32 %v1213_v54, %v602_v47  ;;  %v4600_v47 = vld [vmem:[#allocation11_spill] sm:$0xff] }
 0x168   : > { %v3764_v51 = vadd.f32 %v1603_v27, %v1438_v52  ;;  %v612_v39 = vadd.f32 %v3317_v8, %v4597_v62  ;;  %v1440_v52 = vadd.f32 %v1408_v32, %v1243_v17  ;;  %v1047_v54 = vsel %vm855_vm11, %v4600_v47, 0.0  ;;  %v4601_v17 = vld [vmem:[#allocation19_spill] sm:$0xff]  ;;  %v4603_v62 = vld [vmem:[#allocation80_spill] sm:$0xff] }
 0x169   : > { %v3774_v16 = vadd.f32 %v1214_v35, %v607_v15  ;;  %v1493_v7 = vpop.permute.xlu1 %1492  ;;  %v1215_v15 = vmul.f32 %v3661_v2, %v4599_v9  ;;  %v1054_v32 = vsel %vm862_vm12, %v4601_v17, 0.0  ;;  %v1412_v9 = vmul.f32 %v3684_v33, %v4604_v56  ;;  %v4605_v47 = vld [vmem:[#allocation44_spill] sm:$0xff]  ;;  %v4610_v17 = vld [vmem:[#allocation85_spill] sm:$0xff] }
 0x16a   : > { %v1605_v27 = vmul.f32 %v3712_v59, %v1493_v7  ;;  %v1119_v10 = vpop.permute.xlu0 %1118  ;;  %vm4638_vm11 = vcmp.gt.f32.partialorder %v3551_v1, 0.05  ;;  %vm4641_vm12 = vcmp.gt.f32.partialorder %v3555_v24, 0.05 }
 0x16b   : > { %v1216_v41 = vmul.f32 %v3661_v2, %v1119_v10  ;;  %1955 = vperm.xlu0 %2555, %v1052_v49   ;;  %1920 = vperm.xlu1 %2556, %v1045_v42   ;;  %v627_v49 = vadd.f32 %v4602_v23, %v3317_v8  ;;  %v1247_v7 = vadd.f32 %v1215_v15, %v612_v39  ;;  %v4606_v39 = vld [vmem:[#allocation12_spill] sm:$0xff] }
 0x16c   : > { %v3784_v35 = vadd.f32 %v1605_v27, %v1440_v52  ;;  %v622_v10 = vadd.f32 %v3317_v8, %v4603_v62  ;;  %v1442_v52 = vadd.f32 %v1410_v13, %v1245_v60  ;;  %v1049_v15 = vsel %vm4607_vm1, %v4606_v39, 0.0  ;;  %v4608_v60 = vld [vmem:[#allocation21_spill] sm:$0xff]  ;;  %v4611_v62 = vld [vmem:[#allocation86_spill] sm:$0xff]  ;;  %v4614_v39 = vld [vmem:[#allocation43_spill] sm:$0xff] }
 0x16d   : > { %v3794_v42 = vadd.f32 %v1216_v41, %v617_v44  ;;  %v1501_v28 = vpop.permute.xlu1 %1500  ;;  %v1217_v44 = vmul.f32 %v3661_v2, %v4605_v47  ;;  %v1056_v13 = vsel %vm4609_vm2, %v4608_v60, 0.0  ;;  %v1051_v47 = vsel %vm4613_vm4, %v4612_v0, 0.0  ;;  %v4617_v60 = vld [vmem:[#allocation49_spill] sm:$0xff] }
 0x16e   : > { %v1607_v27 = vmul.f32 %v3712_v59, %v1501_v28  ;;  %v1127_v50 = vpop.permute.xlu0 %1126  ;;  %vm4648_vm1 = vcmp.gt.f32.partialorder %v3570_v25, 0.05  ;;  %vm4650_vm2 = vcmp.gt.f32.partialorder %v3574_v26, 0.05  ;;  %v4654_v26 = vld [vmem:[#allocation58_spill] sm:$0xff] }
 0x16f   : > { %v1218_v34 = vmul.f32 %v3661_v2, %v1127_v50  ;;  %1965 = vperm.xlu0 %2555, %v1054_v32   ;;  %1930 = vperm.xlu1 %2556, %v1047_v54   ;;  %v637_v32 = vadd.f32 %v4610_v17, %v3317_v8  ;;  %v1249_v28 = vadd.f32 %v1217_v44, %v622_v10  ;;  %vm4661_vm4 = vcmp.gt.f32.partialorder %v3591_v36, 0.05  ;;  %v4664_v36 = vld [vmem:[#allocation34_spill] sm:$0xff] }
 0x170   : > { %v3804_v41 = vadd.f32 %v1607_v27, %v1442_v52  ;;  %v632_v50 = vadd.f32 %v3317_v8, %v4611_v62  ;;  %v1444_v52 = vadd.f32 %v1412_v9, %v1247_v7  ;;  %v4616_v7 = vld [vmem:[#allocation48_spill] sm:$0xff]  ;;  %v1221_v17 = vmul.f32 %v3661_v2, %v4617_v60  ;;  %v4619_v62 = vld [vmem:[#allocation23_spill] sm:$0xff] }
 0x171   : > { %v3814_v54 = vadd.f32 %v1218_v34, %v627_v49  ;;  %v1509_v23 = vpop.permute.xlu1 %1508  ;;  %v1414_v49 = vmul.f32 %v3684_v33, %v4614_v39  ;;  %v4615_v34 = vld [vmem:[#allocation46_spill] sm:$0xff]  ;;  %v647_v9 = vadd.f32 %v4616_v7, %v3317_v8  ;;  %v4621_v7 = vld [vmem:[#allocation16_spill] sm:$0xff] }
 0x172   : > { %v1609_v27 = vmul.f32 %v3712_v59, %v1509_v23  ;;  %v1135_v56 = vpop.permute.xlu0 %1134  ;;  %v1219_v10 = vmul.f32 %v3661_v2, %v4615_v34  ;;  %v1053_v60 = vsel %vm4622_vm7, %v4621_v7, 0.0 }
 0x173   : > { %v1220_v20 = vmul.f32 %v3661_v2, %v1135_v56  ;;  %1975 = vperm.xlu0 %2555, %v1056_v13   ;;  %1940 = vperm.xlu1 %2556, %v1049_v15   ;;  %v4618_v13 = vld [vmem:[#allocation51_spill] sm:$0xff]  ;;  %v1058_v56 = vsel %vm4620_vm6, %v4619_v62, 0.0  ;;  %v1446_v39 = vadd.f32 %v1414_v49, %v1249_v28  ;;  %v1060_v28 = vsel %vm4625_vm8, %v4624_v58, 0.0  ;;  %v4626_v49 = vld [vmem:[#allocation52_spill] sm:$0xff]  ;;  %v4627_v62 = vld [vmem:[#allocation53_spill] sm:$0xff] }
 0x174   : > { %v3827_v44 = vadd.f32 %v1609_v27, %v1444_v52  ;;  %v642_v15 = vadd.f32 %v3317_v8, %v4618_v13  ;;  %v1251_v0 = vadd.f32 %v1219_v10, %v632_v50  ;;  %v657_v10 = vadd.f32 %v4626_v49, %v3317_v8  ;;  %v4632_v58 = vld [vmem:[#allocation56_spill] sm:$0xff] }
 0x175   : > { %v3835_v23 = vadd.f32 %v1220_v20, %v637_v32  ;;  %v1517_v57 = vpop.permute.xlu1 %1516  ;;  %v4623_v32 = vld [vmem:[#allocation45_spill] sm:$0xff]  ;;  %v1223_v40 = vmul.f32 %v3661_v2, %v4627_v62  ;;  %v667_v49 = vadd.f32 %v4632_v58, %v3317_v8  ;;  %v4637_v58 = vld [vmem:[#allocation20_spill] sm:$0xff] }
 0x176   : > { %v1611_v52 = vmul.f32 %v3712_v59, %v1517_v57  ;;  %v1143_v27 = vpop.permute.xlu0 %1142  ;;  %v1416_v20 = vmul.f32 %v3684_v33, %v4623_v32  ;;  %v1253_v50 = vadd.f32 %v1221_v17, %v642_v15  ;;  %v4629_v17 = vld [vmem:[#allocation18_spill] sm:$0xff]  ;;  %v4631_v15 = vld [vmem:[#allocation47_spill] sm:$0xff] }
 0x177   : > { %v1222_v34 = vmul.f32 %v3661_v2, %v1143_v27  ;;  %1985 = vperm.xlu0 %2555, %v1058_v56   ;;  %1950 = vperm.xlu1 %2556, %v1051_v47   ;;  %v4628_v56 = vld [vmem:[#allocation55_spill] sm:$0xff] }
 0x178   : > { %v3847_v13 = vadd.f32 %v1611_v52, %v1446_v39  ;;  %v652_v27 = vadd.f32 %v3317_v8, %v4628_v56  ;;  %v1448_v7 = vadd.f32 %v1416_v20, %v1251_v0  ;;  %v4633_v0 = vld [vmem:[#allocation57_spill] sm:$0xff]  ;;  %v4635_v56 = vld [vmem:[#allocation26_spill] sm:$0xff] }
 0x179   : > { %v3854_v57 = vadd.f32 %v1222_v34, %v647_v9  ;;  %v1525_v47 = vpop.permute.xlu1 %1524  ;;  %v1055_v9 = vsel %vm4630_vm9, %v4629_v17, 0.0  ;;  %v1418_v34 = vmul.f32 %v3684_v33, %v4631_v15  ;;  %v1225_v20 = vmul.f32 %v3661_v2, %v4633_v0 }
 0x17a   : > { %v1613_v39 = vmul.f32 %v3712_v59, %v1525_v47  ;;  %v1151_v52 = vpop.permute.xlu0 %1150  ;;  %v4634_v47 = vld [vmem:[#allocation59_spill] sm:$0xff]  ;;  %v1062_v37 = vsel %vm4636_vm10, %v4635_v56, 0.0  ;;  %v1057_v0 = vsel %vm4638_vm11, %v4637_v58, 0.0 }
 0x17b   : > { %v1224_v19 = vmul.f32 %v3661_v2, %v1151_v52  ;;  %1995 = vperm.xlu0 %2555, %v1060_v28   ;;  %1960 = vperm.xlu1 %2556, %v1053_v60   ;;  %v662_v62 = vadd.f32 %v3317_v8, %v4634_v47  ;;  %v1255_v52 = vadd.f32 %v1223_v40, %v652_v27  ;;  %v4642_v27 = vld [vmem:[#allocation62_spill] sm:$0xff]  ;;  %v4644_v56 = vld [vmem:[#allocation63_spill] sm:$0xff] }
 0x17c   : > { %v3867_v32 = vadd.f32 %v1613_v39, %v1448_v7  ;;  %v1450_v17 = vadd.f32 %v1418_v34, %v1253_v50  ;;  %v1064_v50 = vsel %vm4641_vm12, %v4640_v18, 0.0  ;;  %v677_v34 = vadd.f32 %v4642_v27, %v3317_v8  ;;  %v4649_v18 = vld [vmem:[#allocation30_spill] sm:$0xff] }
 0x17d   : > { %v3875_v28 = vadd.f32 %v1224_v19, %v657_v10  ;;  %v1533_v60 = vpop.permute.xlu1 %1532  ;;  %v4639_v10 = vld [vmem:[#allocation50_spill] sm:$0xff]  ;;  %v1257_v40 = vadd.f32 %v1225_v20, %v662_v62  ;;  %v1227_v1 = vmul.f32 %v3661_v2, %v4644_v56 }
 0x17e   : > { %v1615_v7 = vmul.f32 %v3712_v59, %v1533_v60  ;;  %v1159_v39 = vpop.permute.xlu0 %1158  ;;  %v1420_v19 = vmul.f32 %v3684_v33, %v4639_v10  ;;  %v4646_v10 = vld [vmem:[#allocation54_spill] sm:$0xff] }
 0x17f   : > { %v1226_v15 = vmul.f32 %v3661_v2, %v1159_v39  ;;  %2005 = vperm.xlu0 %2555, %v1062_v37   ;;  %1970 = vperm.xlu1 %2556, %v1055_v9   ;;  %v4645_v37 = vld [vmem:[#allocation65_spill] sm:$0xff]  ;;  %v1422_v24 = vmul.f32 %v3684_v33, %v4646_v10  ;;  %v4647_v62 = vld [vmem:[#allocation22_spill] sm:$0xff] }
 0x180   : > { %v3887_v47 = vadd.f32 %v1615_v7, %v1450_v17  ;;  %v672_v39 = vadd.f32 %v3317_v8, %v4645_v37  ;;  %v1452_v58 = vadd.f32 %v1420_v19, %v1255_v52  ;;  %v1066_v52 = vsel %vm4650_vm2, %v4649_v18, 0.0  ;;  %v4652_v37 = vld [vmem:[#allocation69_spill] sm:$0xff]  ;;  %v4658_v18 = vld [vmem:[#allocation68_spill] sm:$0xff] }
 0x181   : > { %v3894_v60 = vadd.f32 %v1226_v15, %v667_v49  ;;  %v1541_v9 = vpop.permute.xlu1 %1540  ;;  %v1059_v15 = vsel %vm4648_vm1, %v4647_v62, 0.0 }
 0x182   : > { %v1617_v17 = vmul.f32 %v3712_v59, %v1541_v9  ;;  %v1167_v7 = vpop.permute.xlu0 %1166  ;;  %v1454_v9 = vadd.f32 %v1422_v24, %v1257_v40  ;;  %v1259_v56 = vadd.f32 %v1227_v1, %v672_v39  ;;  %v4655_v40 = vld [vmem:[#allocation25_spill] sm:$0xff]  ;;  %v4656_v39 = vld [vmem:[#allocation75_spill] sm:$0xff] }
 0x183   : > { %4643 = vst [vmem:[#allocation9_spill] sm:$0xff] %v3894_v60  ;;  %v1228_v20 = vmul.f32 %v3661_v2, %v1167_v7  ;;  %2015 = vperm.xlu0 %2555, %v1064_v50   ;;  %1980 = vperm.xlu1 %2556, %v1057_v0   ;;  %v1229_v7 = vmul.f32 %v3661_v2, %v4652_v37  ;;  %v4653_v50 = vld [vmem:[#allocation71_spill] sm:$0xff]  ;;  %v1061_v1 = vsel %vm869_vm14, %v4655_v40, 0.0  ;;  %vm4665_vm14 = vcmp.gt.f32.partialorder %v3608_v63, 0.05 }
 0x184   : > { %v3904_v49 = vadd.f32 %v1617_v17, %v1452_v58  ;;  %v682_v0 = vadd.f32 %v3317_v8, %v4653_v50  ;;  %v1231_v24 = vmul.f32 %v3661_v2, %v4656_v39 }
 0x185   : > { %v3912_v19 = vadd.f32 %v1228_v20, %v677_v34  ;;  %v1549_v27 = vpop.permute.xlu1 %1548  ;;  %v1424_v34 = vmul.f32 %v3684_v33, %v4654_v26  ;;  %v4657_v20 = vld [vmem:[#allocation77_spill] sm:$0xff]  ;;  %v4662_v26 = vld [vmem:[#allocation64_spill] sm:$0xff] }
 0x186   : > { %v1619_v58 = vmul.f32 %v3712_v59, %v1549_v27  ;;  %v1175_v17 = vpop.permute.xlu0 %1174  ;;  %v692_v62 = vadd.f32 %v3317_v8, %v4657_v20  ;;  %v1426_v40 = vmul.f32 %v3684_v33, %v4662_v26 }
 0x187   : > { %4651 = vst [vmem:[#allocation79_spill] sm:$0xff] %v3912_v19  ;;  %v1230_v25 = vmul.f32 %v3661_v2, %v1175_v17  ;;  %2025 = vperm.xlu0 %2555, %v1066_v52   ;;  %1990 = vperm.xlu1 %2556, %v1059_v15   ;;  %v4660_v15 = vld [vmem:[#allocation32_spill] sm:$0xff]  ;;  %v1456_v50 = vadd.f32 %v1424_v34, %v1259_v56  ;;  %v1070_v56 = vsel %vm4665_vm14, %v4664_v36, 0.0 }
 0x188   : > { %v3922_v10 = vadd.f32 %v1619_v58, %v1454_v9  ;;  %v1068_v37 = vsel %vm4661_vm4, %v4660_v15, 0.0  ;;  %v1261_v9 = vadd.f32 %v1229_v7, %v682_v0  ;;  %v1263_v7 = vadd.f32 %v1231_v24, %v692_v62  ;;  %v4666_v0 = vld [vmem:[#allocation74_spill] sm:$0xff]  ;;  %v4669_v15 = vld [vmem:[#allocation84_spill] sm:$0xff]  ;;  %v4671_v62 = vld [vmem:[#allocation29_spill] sm:$0xff] }
 0x189   : > { %v3932_v27 = vadd.f32 %v1230_v25, %v4658_v18  ;;  %v1557_v52 = vpop.permute.xlu1 %1556  ;;  %v4663_v25 = vld [vmem:[#allocation27_spill] sm:$0xff] }
 0x18a   : > { %v1621_v58 = vmul.f32 %v3712_v59, %v1557_v52  ;;  %v1183_v5 = vpop.permute.xlu0 %1182  ;;  %v1063_v20 = vsel %vm871_vm0, %v4663_v25, 0.0  ;;  %v4668_v52 = vld [vmem:[#allocation82_spill] sm:$0xff]  ;;  %v1431_v25 = vmul.f32 %v3684_v33, %v3653_v11 }
 0x18b   : > { %4659 = vst [vmem:[#allocation13_spill] sm:$0xff] %v3932_v27  ;;  %v1232_v17 = vmul.f32 %v3661_v2, %v1183_v5  ;;  %2035 = vperm.xlu0 %2555, %v1068_v37   ;;  %2000 = vperm.xlu1 %2556, %v1061_v1   ;;  %v1233_v1 = vmul.f32 %v3661_v2, %v4668_v52  ;;  %v4670_v5 = vld [vmem:[#allocation70_spill] sm:$0xff]  ;;  %v4673_v52 = vld [vmem:[#allocation88_spill] sm:$0xff] }
 0x18c   : > { %v3941_v39 = vadd.f32 %v1621_v58, %v1456_v50  ;;  %v702_v37 = vadd.f32 %v3317_v8, %v4669_v15  ;;  %v1458_v50 = vadd.f32 %v1426_v40, %v1261_v9  ;;  %v1428_v26 = vmul.f32 %v3684_v33, %v4670_v5  ;;  %v4672_v9 = vld [vmem:[#allocation81_spill] sm:$0xff]  ;;  %v4675_v5 = vld [vmem:[#allocation76_spill] sm:$0xff] }
 0x18d   : > { %v3950_v34 = vadd.f32 %v1232_v17, %v4666_v0  ;;  %v1565_v18 = vpop.permute.xlu1 %1564  ;;  %v1065_v17 = vsel %vm873_vm13, %v4671_v62, 0.0  ;;  %v1235_v15 = vmul.f32 %v3661_v2, %v4673_v52 }
 0x18e   : > { %v1623_v58 = vmul.f32 %v3712_v59, %v1565_v18  ;;  %v1191_v61 = vpop.permute.xlu0 %1190  ;;  %v1460_v0 = vadd.f32 %v1428_v26, %v1263_v7  ;;  %v1265_v18 = vadd.f32 %v1233_v1, %v702_v37  ;;  %v1430_v7 = vmul.f32 %v3684_v33, %v4675_v5  ;;  %v3983_v37 = vld [vmem:[%s4446_s5 + $0x23] ss:$0 sm:$0xff]  ;;  %v4677_v26 = vld [vmem:[#allocation87_spill] sm:$0xff] }
 0x18f   : > { %4667 = vst [vmem:[#allocation60_spill] sm:$0xff] %v3950_v34  ;;  %v1234_v63 = vmul.f32 %v3661_v2, %v1191_v61  ;;  %2045 = vperm.xlu0 %2555, %v1070_v56   ;;  %2010 = vperm.xlu1 %2556, %v1063_v20   ;;  %v4674_v61 = vld [vmem:[#allocation89_spill] sm:$0xff] }
 0x190   : > { %v3960_v24 = vadd.f32 %v1623_v58, %v1458_v50  ;;  %v712_v20 = vadd.f32 %v3317_v8, %v4674_v61  ;;  %v1433_v8 = vmul.f32 %v3684_v33, %v3676_v38  ;;  %v4680_v61 = vld [vmem:[#allocation83_spill] sm:$0xff] }
 0x191   : > { %v1266_v40 = vadd.f32 %v1234_v63, %v4672_v9  ;;  %v1573_v36 = vpop.permute.xlu1 %1572  ;;  %v1462_v9 = vadd.f32 %v1430_v7, %v1265_v18 }
 0x192   : > { %v1625_v56 = vmul.f32 %v3712_v59, %v1573_v36  ;;  %v1199_v50 = vpop.permute.xlu0 %1198 }
 0x193   : > { %v1463_v58 = vadd.f32 %v1431_v25, %v1266_v40  ;;  %v1236_v11 = vmul.f32 %v3661_v2, %v1199_v50  ;;  %2020 = vperm.xlu1 %2556, %v1065_v17   ;;  %v4679_v2 = vld [vmem:[#allocation31_spill] sm:$0xff]  ;;  %v1267_v25 = vadd.f32 %v1235_v15, %v712_v20  ;;  %v4683_v20 = vld [vmem:[#allocation33_spill] sm:$0xff] }
 0x194   : > { %v3978_v1 = vadd.f32 %v1625_v56, %v1460_v0  ;;  %v1067_v17 = vsel %vm875_vm15, %v4679_v2, 0.0  ;;  %v1630_v0 = vmul.f32 %v3712_v59, %v3645_v30  ;;  %v1432_v56 = vmul.f32 %v3684_v33, %v4680_v61  ;;  %v2380_v61 = vld [vmem:[%s4445_s4 + $0x18] sm:$0xff] }
 0x195   : > { %v1268_v63 = vadd.f32 %v1236_v11, %v4677_v26  ;;  %v1581_v31 = vpop.permute.xlu1 %1580  ;;  %v3988_v62 = vadd.f32 %v1628_v22, %v1463_v58  ;;  %v1069_v22 = vsel %vm877_vm3, %v4683_v20, 0.0  ;;  %v2153_v26 = vld [vmem:[%s354_s13] sm:$0xff]  ;;  %vm2165_vm15 = vcmask 130048  }
 0x196   : > { %4676 = vst [vmem:[#allocation61_spill] sm:$0xff] %v3978_v1  ;;  %v1627_v40 = vmul.f32 %v3712_v59, %v1581_v31  ;;  %v1672_v36 = vpop.permute.xlu0 %1671  ;;  %v1464_v30 = vadd.f32 %v1432_v56, %v1267_v25  ;;  %v2155_v31 = vmax.f32 %v2153_v26, 0.0 }
 0x197   : > { %4678 = vst [vmem:[#allocation36_spill] sm:$0xff] %v3988_v62  ;;  %v1465_v52 = vadd.f32 %v1433_v8, %v1268_v63  ;;  %v1829_v38 = vmul.f32 %v3983_v37, %v1672_v36  ;;  %2030 = vperm.xlu1 %2556, %v1067_v17   ;;  %v2154_v63 = vld [vmem:[%s354_s13 + $0x8] sm:$0xff] }
 0x198   : > { %v3999_v50 = vadd.f32 %v1627_v40, %v1462_v9  ;;  %v2156_v2 = vmax.f32 %v2154_v63, 0.0  ;;  %v2157_v17 = vmin.f32 %v2155_v31, 1.0  ;;  %v2162_v36 = vld [vmem:[%s4445_s4 + $0x8] sm:$0xff] }
 0x199   : > { %v4002_v12 = vadd.f32 %v1829_v38, %v3724_v53  ;;  %v1589_v18 = vpop.permute.xlu1 %1588  ;;  %v4004_v15 = vadd.f32 %v1630_v0, %v1465_v52  ;;  %v4685_v53 = vld [vmem:[#allocation35_spill] sm:$0xff]  ;;  %v2379_v0 = vld [vmem:[%s4445_s4 + $0x10] sm:$0xff] }
 0x19a   : > { %4681 = vst [vmem:[#allocation38_spill] sm:$0xff] %v3999_v50  ;;  %v1629_v58 = vmul.f32 %v3712_v59, %v1589_v18  ;;  %v4010_v11 = vpop.permute.xlu0 %1686  ;;  %v1071_v7 = vsel %vm879_vm5, %v4685_v53, 0.0  ;;  %v2158_v25 = vmin.f32 %v2156_v2, 1.0  ;;  %vm2159_vm0 = vcmp.gt.f32.partialorder %v2157_v17, 0.05 }
 0x19b   : > { %4682 = vst [vmem:[#allocation8_spill] sm:$0xff] %v4004_v15  ;;  %2040 = vperm.xlu1 %2556, %v1069_v22   ;;  %v2163_v52 = vsel %vm2159_vm0, %v2161_v14, 0.0  ;;  %v2171_v20 = vsel %vm2159_vm0, %v2379_v0, 0.0 }
 0x19c   : > { %v4012_v5 = vadd.f32 %v1629_v58, %v1464_v30  ;;  %vm2160_vm13 = vcmp.gt.f32.partialorder %v2158_v25, 0.05  ;;  %2166 = vst.msk [vmem:[%s339_s10] sm:$0xff] %vm2165_vm15, %v2163_v52  ;;  %2381 = vst.msk [vmem:[%s339_s10 + $0x10] sm:$0xff] %vm2165_vm15, %v2171_v20 }
 0x19d   : > { %v2164_v38 = vsel %vm2160_vm13, %v2162_v36, 0.0  ;;  %v2172_v22 = vsel %vm2160_vm13, %v2380_v61, 0.0 }
 0x19e   : > { %4684 = vst [vmem:[#allocation15_spill] sm:$0xff] %v4012_v5  ;;  %v4021_v3 = vpop.permute.xlu0 %1696  ;;  %v4023_v8 = vpop.permute.xlu1 %1666  ;;  %2167 = vst.msk [vmem:[%s339_s10 + $0x8] sm:$0xff] %vm2165_vm15, %v2164_v38 }
 0x19f   : > { %2050 = vperm.xlu1 %2556, %v1071_v7   ;;  %2382 = vst.msk [vmem:[%s339_s10 + $0x18] sm:$0xff] %vm2165_vm15, %v2172_v22 }
 0x1a2   : > { %v4025_v9 = vpop.permute.xlu0 %1706  ;;  %v4027_v40 = vpop.permute.xlu1 %1676 }
 0x1a6   : > { %v4045_v56 = vpop.permute.xlu0 %1716  ;;  %v4047_v18 = vpop.permute.xlu1 %1681 }
 0x1aa   : > { %v4057_v30 = vpop.permute.xlu0 %1726  ;;  %v4059_v58 = vpop.permute.xlu1 %1691 }
 0x1ab   : > { %2572 = shalt.err (!%p2569_p3)
}
 0x1ac   : > { %s2573_s26 = scalar_lea.hbm %s4053_s18, 512  ;;  %s2577_s13 = scalar_lea.hbm %s4449_s8, 1024 }
 0x1ad   : > { %p2574_p4 = scmp.ne.s32.totalorder %s4053_s18, %s2573_s26  ;;  %p2578_p9 = scmp.lt.u32.totalorder %s4053_s18, %s4449_s8 }
 0x1ae   : > { %p2579_p10 = scmp.lt.u32.totalorder %s2577_s13, %s2573_s26  ;;  %p2581_p12 = scmp.lt.u32.totalorder %s2573_s26, %s4053_s18 }
 0x1af   : > { %p2575_p7 = pnand %p2574_p4, %p2746_p5 }
 0x1b0   : > { %p2580_p11 = por %p2579_p10, %p2578_p9 }
 0x1b1   : > { %p2576_p8 = pneg %p2575_p7 }
 0x1b2   : > { %p2582_p13 = por %p2581_p12, %p2580_p11 }
 0x1b4   : > { %p2583_p0 = pnand %p2582_p13, %p2576_p8 }
 0x1b6   : > { %2586 = shalt.err (!%p2583_p0)
}
 0x1b7   : > { %s2660_s21 = smov 128   ;;  %s2661_s25 = smov 8   ;;  %v4088_v53 = vpop.permute.xlu0 %1736  ;;  %v4090_v7 = vpop.permute.xlu1 %1701  ;;  %v4688_v15 = vld [vmem:[#allocation91_spill] sm:$0xff]  ;;  %v4691_v50 = vld [vmem:[#allocation90_spill] sm:$0xff]  ;;  %v1828_v19 = vmul.f32 %v3983_v37, %v4023_v8  ;;  %v1832_v8 = vmul.f32 %v3983_v37, %v4010_v11  ;;  %vm4692_vm3 = vcmask 261120   ;;  %v1834_v11 = vmul.f32 %v3983_v37, %v4021_v3 }
 0x1b8   : > { %2501 = dma.vmem_to_hbm [thread:$0]  (%p2746_p5), %s4055_s20, 512, %s4053_s18, %s2182_s22, %s2660_s21, %s2660_s21, %s2661_s25   ;;  %v1402_v62 = vmul.f32 %v3684_v33, %v4688_v15  ;;  %v1599_v55 = vmul.f32 %v3712_v59, %v4691_v50  ;;  %vm4693_vm5 = vmmov %vm4692_vm3 }
 0x1b9   : > { %s2333_s22 = sshll.u32 %s4030_s19, 8  ;;  %vm4695_vm6 = vmmov %vm4692_vm3  ;;  %s2394_s17 = sshll.u32 %s2729_s9, 12 }
 0x1ba   : > { %v1434_v34 = vadd.f32 %v1402_v62, %v3688_v48  ;;  %v1830_v62 = vmul.f32 %v3983_v37, %v4027_v40  ;;  %s4147_s23 = scalar_lea.vmem [#allocation2], %s2333_s22  ;;  %v1864_v40 = vadd.f32 %v1832_v8, %v3764_v51  ;;  %v1836_v51 = vmul.f32 %v3983_v37, %v4025_v9  ;;  %vm4698_vm7 = vmmov %vm4692_vm3  ;;  %s4391_s22 = scalar_lea.hbm %s4448_s7, %s2394_s17 }
 0x1bb   : > { %v4092_v26 = vpop.permute.xlu0 %1746  ;;  %v4094_v63 = vpop.permute.xlu1 %1711  ;;  %vm4701_vm8 = vmmov %vm4692_vm3  ;;  %s2195_s24 = sshll.u32 %s4147_s23, 4  ;;  %s2177_s9 = scalar_lea.sflag [#allocation3], %s4030_s19  ;;  %s4393_s24 = int_to_ptr.vmem [resolvable:$true] %s2195_s24 }
 0x1bc   : > { %v1862_v60 = vadd.f32 %v1830_v62, %v3744_v29  ;;  %v4694_v62 = vld [vmem:[#allocation94_spill] sm:$0xff]  ;;  %v1868_v9 = vadd.f32 %v1836_v51, %v3804_v41  ;;  %vm4702_vm9 = vmmov %vm4692_vm3  ;;  %s2587_s26 = scalar_lea.vmem %s4393_s24, 4096  ;;  %s2662_s10 = smov [#allocation2]  }
 0x1bd   : > { %v4700_v51 = vld [vmem:[#allocation98_spill] sm:$0xff]  ;;  %vm4705_vm10 = vmmov %vm4692_vm3  ;;  %p2588_p1 = scmp.ne.s32.totalorder %s4393_s24, %s2587_s26  ;;  %s2591_s12 = sshll.u32 %s2662_s10, 4  ;;  %s2592_s12 = int_to_ptr.vmem [resolvable:$false] %s2591_s12 }
 0x1be   : > { %vm4706_vm11 = vmmov %vm4692_vm3  ;;  %s2593_s13 = scalar_lea.vmem %s2592_s12, 8192  ;;  %p2594_p4 = scmp.lt.s32.totalorder %s4393_s24, %s2592_s12 }
 0x1bf   : > { %v4096_v31 = vpop.permute.xlu0 %1756  ;;  %v4098_v2 = vpop.permute.xlu1 %1721  ;;  %vm4709_vm12 = vmmov %vm4692_vm3  ;;  %p2589_p2 = pnand %p2588_p1, %p2746_p5  ;;  %p2595_p7 = scmp.lt.s32.totalorder %s2593_s13, %s2587_s26 }
 0x1c0   : > { %vm4710_vm1 = vmmov %vm4692_vm3 }
 0x1c1   : > { %vm4713_vm2 = vmmov %vm4710_vm1  ;;  %p2590_p3 = pneg %p2589_p2  ;;  %p2596_p8 = por %p2595_p7, %p2594_p4 }
 0x1c2   : > { %vm4714_vm4 = vmmov %vm4710_vm1 }
 0x1c3   : > { %v4100_v17 = vpop.permute.xlu0 %1766  ;;  %v4102_v25 = vpop.permute.xlu1 %1731  ;;  %vm4717_vm14 = vmmov %vm4710_vm1  ;;  %p2597_p9 = pnand %p2596_p8, %p2590_p3 }
 0x1c4   : > { %vm4718_vm0 = vmmov %vm4710_vm1 }
 0x1c5   : > { %vm4721_vm13 = vmmov %vm4718_vm0 }
 0x1c6   : > { %vm4722_vm15 = vmmov %vm4718_vm0 }
 0x1c7   : > { %v4104_v14 = vpop.permute.xlu0 %1776  ;;  %v4106_v36 = vpop.permute.xlu1 %1741 }
 0x1cb   : > { %v4108_v0 = vpop.permute.xlu0 %1786  ;;  %v4110_v52 = vpop.permute.xlu1 %1751 }
 0x1cf   : > { %v4112_v38 = vpop.permute.xlu0 %1796  ;;  %v4114_v61 = vpop.permute.xlu1 %1761 }
 0x1d3   : > { %v4116_v20 = vpop.permute.xlu0 %1806  ;;  %v4118_v22 = vpop.permute.xlu1 %1771 }
 0x1d4   : > { %4686 = vst [vmem:[#allocation66_spill] sm:$0xff] %v4116_v20  ;;  %4687 = vst [vmem:[#allocation67_spill] sm:$0xff] %v4118_v22  ;;  %v4134_v20 = vld [vmem:[%s4446_s5 + $0x24] ss:$0 sm:$0xff]  ;;  %v1631_v22 = vadd.f32 %v1599_v55, %v1434_v34 }
 0x1d6   : > { %v1860_v48 = vadd.f32 %v1828_v19, %v1631_v22 }
 0x1d7   : > { %v4123_v5 = vpop.permute.xlu0 %1816  ;;  %v4125_v27 = vpop.permute.xlu1 %1781 }
 0x1d8   : > { %4689 = vst [vmem:[#allocation37_spill] sm:$0xff] %v4123_v5  ;;  %4690 = vst [vmem:[#allocation40_spill] sm:$0xff] %v4125_v27 }
 0x1db   : > { %v1896_v15 = vpop.permute.xlu0 %1895  ;;  %v4137_v1 = vpop.permute.xlu1 %1791 }
 0x1dc   : > { %v2057_v27 = vmul.f32 %v4134_v20, %v1896_v15 }
 0x1de   : > { %v2089_v50 = vadd.f32 %v2057_v27, %v1860_v48 }
 0x1df   : > { %v1906_v5 = vpop.permute.xlu0 %1905  ;;  %v4142_v6 = vpop.permute.xlu1 %1801 }
 0x1e0   : > { %2121 = vst.msk [vmem:[%s4147_s23] sm:$0xff] %vm4692_vm3, %v2089_v50  ;;  %v2059_v55 = vmul.f32 %v4134_v20, %v1906_v5  ;;  %v1866_v5 = vadd.f32 %v1834_v11, %v3784_v35  ;;  %vm4724_vm3 = vmmov %vm4718_vm0 }
 0x1e2   : > { %v2091_v19 = vadd.f32 %v2059_v55, %v1862_v60  ;;  %v1405_v60 = vmul.f32 %v3684_v33, %v4694_v62  ;;  %v4696_v55 = vld [vmem:[#allocation92_spill] sm:$0xff] }
 0x1e3   : > { %v1916_v34 = vpop.permute.xlu0 %1915  ;;  %v4152_v27 = vpop.permute.xlu1 %1811 }
 0x1e4   : > { %2123 = vst.msk [vmem:[%s4147_s23 + $0x10] sm:$0xff] %vm4693_vm5, %v2091_v19  ;;  %v2061_v29 = vmul.f32 %v4134_v20, %v1916_v34  ;;  %v1437_v50 = vadd.f32 %v1405_v60, %v3714_v45  ;;  %v1602_v19 = vmul.f32 %v3712_v59, %v4696_v55  ;;  %v4697_v34 = vld [vmem:[#allocation96_spill] sm:$0xff]  ;;  %vm4725_vm5 = vmmov %vm4718_vm0 }
 0x1e6   : > { %v2093_v22 = vadd.f32 %v2061_v29, %v1864_v40  ;;  %v1407_v40 = vmul.f32 %v3684_v33, %v4697_v34  ;;  %v1838_v29 = vmul.f32 %v3983_v37, %v4045_v56  ;;  %v1634_v60 = vadd.f32 %v1602_v19, %v1437_v50 }
 0x1e7   : > { %v1926_v15 = vpop.permute.xlu0 %1925  ;;  %v4160_v48 = vpop.permute.xlu1 %1821 }
 0x1e8   : > { %2125 = vst.msk [vmem:[%s4147_s23 + $0x20] sm:$0xff] %vm4695_vm6, %v2093_v22  ;;  %v2063_v3 = vmul.f32 %v4134_v20, %v1926_v15  ;;  %v1831_v22 = vmul.f32 %v3983_v37, %v4047_v18  ;;  %v1439_v62 = vadd.f32 %v1407_v40, %v3734_v4  ;;  %v1409_v18 = vmul.f32 %v3684_v33, %v4700_v51  ;;  %vm4727_vm6 = vmmov %vm4718_vm0 }
 0x1e9   : > { %v1870_v55 = vadd.f32 %v1838_v29, %v3827_v44  ;;  %v1833_v4 = vmul.f32 %v3983_v37, %v4059_v58  ;;  %v4703_v29 = vld [vmem:[#allocation95_spill] sm:$0xff] }
 0x1ea   : > { %v2095_v8 = vadd.f32 %v2063_v3, %v1866_v5  ;;  %v4699_v3 = vld [vmem:[#allocation93_spill] sm:$0xff]  ;;  %v1441_v44 = vadd.f32 %v1409_v18, %v3754_v46  ;;  %v1835_v46 = vmul.f32 %v3983_v37, %v4090_v7 }
 0x1eb   : > { %v1936_v35 = vpop.permute.xlu0 %1935  ;;  %v1901_v11 = vpop.permute.xlu1 %1900  ;;  %v1604_v41 = vmul.f32 %v3712_v59, %v4699_v3  ;;  %v4707_v18 = vld [vmem:[#allocation97_spill] sm:$0xff] }
 0x1ec   : > { %2127 = vst.msk [vmem:[%s4147_s23 + $0x30] sm:$0xff] %vm4698_vm7, %v2095_v8  ;;  %v2065_v45 = vmul.f32 %v4134_v20, %v1936_v35  ;;  %v2058_v15 = vmul.f32 %v4134_v20, %v1901_v11  ;;  %v1840_v8 = vmul.f32 %v3983_v37, %v4057_v30  ;;  %v1863_v11 = vadd.f32 %v1831_v22, %v1634_v60  ;;  %v4704_v22 = vld [vmem:[#allocation100_spill] sm:$0xff]  ;;  %vm4728_vm7 = vmmov %vm4718_vm0 }
 0x1ed   : > { %v1636_v19 = vadd.f32 %v1604_v41, %v1439_v62  ;;  %v1411_v58 = vmul.f32 %v3684_v33, %v4704_v22 }
 0x1ee   : > { %v2097_v5 = vadd.f32 %v2065_v45, %v1868_v9  ;;  %v2090_v56 = vadd.f32 %v2058_v15, %v4002_v12  ;;  %v1606_v9 = vmul.f32 %v3712_v59, %v4703_v29  ;;  %v1872_v45 = vadd.f32 %v1840_v8, %v3847_v13  ;;  %v4708_v8 = vld [vmem:[#allocation102_spill] sm:$0xff] }
 0x1ef   : > { %v1946_v34 = vpop.permute.xlu0 %1945  ;;  %v1911_v35 = vpop.permute.xlu1 %1910  ;;  %v1842_v15 = vmul.f32 %v3983_v37, %v4088_v53  ;;  %v1443_v13 = vadd.f32 %v1411_v58, %v3774_v16  ;;  %v1413_v7 = vmul.f32 %v3684_v33, %v4708_v8  ;;  %v1837_v16 = vmul.f32 %v3983_v37, %v4094_v63 }
 0x1f0   : > { %2129 = vst.msk [vmem:[%s4147_s23 + $0x40] sm:$0xff] %vm4701_vm8, %v2097_v5  ;;  %v2067_v12 = vmul.f32 %v4134_v20, %v1946_v34  ;;  %v2060_v50 = vmul.f32 %v4134_v20, %v1911_v35  ;;  %v1638_v41 = vadd.f32 %v1606_v9, %v1441_v44  ;;  %v1844_v35 = vmul.f32 %v3983_v37, %v4092_v26  ;;  %v4712_v9 = vld [vmem:[#allocation104_spill] sm:$0xff]  ;;  %vm4735_vm8 = vmmov %vm4718_vm0 }
 0x1f1   : > { %2122 = vst.msk [vmem:[%s4147_s23 + $0x8] sm:$0xff] %vm4702_vm9, %v2090_v56  ;;  %v1865_v56 = vadd.f32 %v1833_v4, %v1636_v19  ;;  %v1874_v34 = vadd.f32 %v1842_v15, %v3867_v32  ;;  %v1445_v32 = vadd.f32 %v1413_v7, %v3794_v42  ;;  %v1415_v63 = vmul.f32 %v3684_v33, %v4712_v9  ;;  %vm4736_vm9 = vmmov %vm4718_vm0 }
 0x1f2   : > { %v2099_v30 = vadd.f32 %v2067_v12, %v1870_v55  ;;  %v2092_v40 = vadd.f32 %v2060_v50, %v1863_v11  ;;  %v1608_v55 = vmul.f32 %v3712_v59, %v4707_v18  ;;  %v1867_v12 = vadd.f32 %v1835_v46, %v1638_v41  ;;  %v4716_v41 = vld [vmem:[#allocation106_spill] sm:$0xff] }
 0x1f3   : > { %v1956_v60 = vpop.permute.xlu0 %1955  ;;  %v1921_v5 = vpop.permute.xlu1 %1920  ;;  %v1876_v22 = vadd.f32 %v1844_v35, %v3887_v47  ;;  %v1846_v58 = vmul.f32 %v3983_v37, %v4096_v31  ;;  %v1839_v42 = vmul.f32 %v3983_v37, %v4098_v2  ;;  %v1447_v47 = vadd.f32 %v1415_v63, %v3814_v54  ;;  %v4723_v63 = vld [vmem:[#allocation105_spill] sm:$0xff] }
 0x1f4   : > { %2131 = vst.msk [vmem:[%s4147_s23 + $0x50] sm:$0xff] %vm4705_vm10, %v2099_v30  ;;  %v2069_v62 = vmul.f32 %v4134_v20, %v1956_v60  ;;  %v2062_v3 = vmul.f32 %v4134_v20, %v1921_v5  ;;  %v1640_v19 = vadd.f32 %v1608_v55, %v1443_v13  ;;  %v1417_v2 = vmul.f32 %v3684_v33, %v4716_v41  ;;  %vm4743_vm10 = vmmov %vm4718_vm0 }
 0x1f5   : > { %2124 = vst.msk [vmem:[%s4147_s23 + $0x18] sm:$0xff] %vm4706_vm11, %v2092_v40  ;;  %v4711_v40 = vld [vmem:[#allocation99_spill] sm:$0xff]  ;;  %v1841_v54 = vmul.f32 %v3983_v37, %v4102_v25  ;;  %vm4744_vm11 = vmmov %vm4718_vm0 }
 0x1f6   : > { %v2101_v53 = vadd.f32 %v2069_v62, %v1872_v45  ;;  %v2094_v51 = vadd.f32 %v2062_v3, %v1865_v56  ;;  %v1610_v29 = vmul.f32 %v3712_v59, %v4711_v40  ;;  %v1869_v60 = vadd.f32 %v1837_v16, %v1640_v19  ;;  %v4715_v3 = vld [vmem:[#allocation101_spill] sm:$0xff]  ;;  %v4720_v16 = vld [vmem:[#allocation108_spill] sm:$0xff] }
 0x1f7   : > { %v1966_v11 = vpop.permute.xlu0 %1965  ;;  %v1931_v4 = vpop.permute.xlu1 %1930  ;;  %v1612_v13 = vmul.f32 %v3712_v59, %v4715_v3  ;;  %v1419_v25 = vmul.f32 %v3684_v33, %v4720_v16  ;;  %v1854_v3 = vmul.f32 %v3983_v37, %v4112_v38  ;;  %v4734_v16 = vld [vmem:[#allocation67_spill] sm:$0xff] }
 0x1f8   : > { %2133 = vst.msk [vmem:[%s4147_s23 + $0x60] sm:$0xff] %vm4709_vm12, %v2101_v53  ;;  %v2071_v50 = vmul.f32 %v4134_v20, %v1966_v11  ;;  %v2064_v44 = vmul.f32 %v4134_v20, %v1931_v4  ;;  %v1642_v46 = vadd.f32 %v1610_v29, %v1445_v32  ;;  %v1878_v53 = vadd.f32 %v1846_v58, %v3904_v49  ;;  %v4719_v4 = vld [vmem:[#allocation103_spill] sm:$0xff]  ;;  %vm4749_vm12 = vmmov %vm4718_vm0 }
 0x1f9   : > { %2126 = vst.msk [vmem:[%s4147_s23 + $0x28] sm:$0xff] %vm4710_vm1, %v2094_v51  ;;  %v1848_v51 = vmul.f32 %v3983_v37, %v4100_v17  ;;  %v1449_v49 = vadd.f32 %v1417_v2, %v3835_v23  ;;  %v1644_v35 = vadd.f32 %v1612_v13, %v1447_v47  ;;  %v1843_v23 = vmul.f32 %v3983_v37, %v4106_v36  ;;  %vm4750_vm1 = vmmov %vm4718_vm0 }
 0x1fa   : > { %v2103_v26 = vadd.f32 %v2071_v50, %v1874_v34  ;;  %v2096_v30 = vadd.f32 %v2064_v44, %v1867_v12  ;;  %v1871_v8 = vadd.f32 %v1839_v42, %v1642_v46  ;;  %v1614_v12 = vmul.f32 %v3712_v59, %v4719_v4  ;;  %v4726_v46 = vld [vmem:[#allocation107_spill] sm:$0xff] }
 0x1fb   : > { %v1976_v45 = vpop.permute.xlu0 %1975  ;;  %v1941_v15 = vpop.permute.xlu1 %1940  ;;  %v1880_v50 = vadd.f32 %v1848_v51, %v3922_v10  ;;  %v1850_v44 = vmul.f32 %v3983_v37, %v4104_v14  ;;  %v1451_v10 = vadd.f32 %v1419_v25, %v3854_v57  ;;  %v1421_v36 = vmul.f32 %v3684_v33, %v3577_v21 }
 0x1fc   : > { %2135 = vst.msk [vmem:[%s4147_s23 + $0x70] sm:$0xff] %vm4713_vm2, %v2103_v26  ;;  %v2073_v5 = vmul.f32 %v4134_v20, %v1976_v45  ;;  %v2066_v56 = vmul.f32 %v4134_v20, %v1941_v15  ;;  %v1873_v26 = vadd.f32 %v1841_v54, %v1644_v35  ;;  %v1646_v29 = vadd.f32 %v1614_v12, %v1449_v49  ;;  %v4733_v35 = vld [vmem:[#allocation66_spill] sm:$0xff]  ;;  %vm4753_vm2 = vmmov %vm4718_vm0 }
 0x1fd   : > { %2128 = vst.msk [vmem:[%s4147_s23 + $0x38] sm:$0xff] %vm4714_vm4, %v2096_v30  ;;  %v1882_v58 = vadd.f32 %v1850_v44, %v3941_v39  ;;  %v1852_v45 = vmul.f32 %v3983_v37, %v4108_v0  ;;  %v1845_v57 = vmul.f32 %v3983_v37, %v4110_v52  ;;  %v1453_v39 = vadd.f32 %v1421_v36, %v3875_v28  ;;  %v4737_v44 = vld [vmem:[#allocation79_spill] sm:$0xff]  ;;  %vm4754_vm4 = vmmov %vm4718_vm0 }
 0x1fe   : > { %v2105_v31 = vadd.f32 %v2073_v5, %v1876_v22  ;;  %v2098_v62 = vadd.f32 %v2066_v56, %v1869_v60  ;;  %v1616_v22 = vmul.f32 %v3712_v59, %v4723_v63  ;;  %v1875_v42 = vadd.f32 %v1843_v23, %v1646_v29  ;;  %v4739_v29 = vld [vmem:[#allocation114_spill] sm:$0xff] }
 0x1ff   : > { %v1986_v18 = vpop.permute.xlu0 %1985  ;;  %v1951_v55 = vpop.permute.xlu1 %1950  ;;  %v1423_v52 = vmul.f32 %v3684_v33, %v3594_v43  ;;  %v1847_v28 = vmul.f32 %v3983_v37, %v4114_v61  ;;  %v1849_v25 = vmul.f32 %v3983_v37, %v4734_v16 }
 0x200   : > { %2137 = vst.msk [vmem:[%s4147_s23 + $0x80] sm:$0xff] %vm4717_vm14, %v2105_v31  ;;  %v2075_v7 = vmul.f32 %v4134_v20, %v1986_v18  ;;  %v2068_v34 = vmul.f32 %v4134_v20, %v1951_v55  ;;  %v1648_v56 = vadd.f32 %v1616_v22, %v1451_v10  ;;  %v1618_v31 = vmul.f32 %v3712_v59, %v4726_v46  ;;  %v2557_v10 = vld [vmem:[%s4446_s5 + $0x21] ss:$0 sm:$0xff]  ;;  %v4741_v22 = vld [vmem:[#allocation37_spill] sm:$0xff]  ;;  %v4746_v46 = vld [vmem:[#allocation111_spill] sm:$0xff] }
 0x201   : > { %2130 = vst.msk [vmem:[%s4147_s23 + $0x48] sm:$0xff] %vm4718_vm0, %v2098_v62  ;;  %v1884_v62 = vadd.f32 %v1852_v45, %v3960_v24  ;;  %v4729_v24 = vld [vmem:[#allocation9_spill] sm:$0xff]  ;;  %v1858_v36 = vmul.f32 %v3983_v37, %v4741_v22  ;;  %vm4755_vm14 = vmmov %vm4718_vm0 }
 0x202   : > { %v2107_v17 = vadd.f32 %v2075_v7, %v1878_v53  ;;  %v2100_v11 = vadd.f32 %v2068_v34, %v1871_v8  ;;  %v1877_v2 = vadd.f32 %v1845_v57, %v1648_v56  ;;  %v1455_v51 = vadd.f32 %v1423_v52, %v4729_v24  ;;  %v4730_v8 = vld [vmem:[#allocation109_spill] sm:$0xff]  ;;  %v4731_v7 = vld [vmem:[#allocation112_spill] sm:$0xff]  ;;  %v4747_v52 = vld [vmem:[#allocation115_spill] sm:$0xff] }
 0x203   : > { %v1996_v32 = vpop.permute.xlu0 %1995  ;;  %v1961_v19 = vpop.permute.xlu1 %1960  ;;  %v1650_v18 = vadd.f32 %v1618_v31, %v1453_v39  ;;  %v1620_v54 = vmul.f32 %v3712_v59, %v4730_v8  ;;  %v1425_v61 = vmul.f32 %v3684_v33, %v4731_v7  ;;  %v4732_v34 = vld [vmem:[#allocation61_spill] sm:$0xff] }
 0x204   : > { %2139 = vst.msk [vmem:[%s4147_s23 + $0x90] sm:$0xff] %vm4721_vm13, %v2107_v17  ;;  %v2077_v30 = vmul.f32 %v4134_v20, %v1996_v32  ;;  %v2070_v40 = vmul.f32 %v4134_v20, %v1961_v19  ;;  %v1886_v49 = vadd.f32 %v1854_v3, %v4732_v34  ;;  %v1856_v17 = vmul.f32 %v3983_v37, %v4733_v35  ;;  %v4748_v3 = vld [vmem:[#allocation15_spill] sm:$0xff]  ;;  %v4752_v7 = vld [vmem:[#allocation113_spill] sm:$0xff]  ;;  %vm4758_vm13 = vmmov %vm4718_vm0 }
 0x205   : > { %2132 = vst.msk [vmem:[%s4147_s23 + $0x58] sm:$0xff] %vm4722_vm15, %v2100_v11  ;;  %v1879_v12 = vadd.f32 %v1847_v28, %v1650_v18  ;;  %v1457_v32 = vadd.f32 %v1425_v61, %v4737_v44  ;;  %v1652_v19 = vadd.f32 %v1620_v54, %v1455_v51  ;;  %v4751_v51 = vld [vmem:[#allocation60_spill] sm:$0xff]  ;;  %v1859_v44 = vmul.f32 %v3983_v37, %v4160_v48  ;;  %vm4759_vm15 = vmmov %vm4718_vm0 }
 0x206   : > { %v2109_v14 = vadd.f32 %v2077_v30, %v1880_v50  ;;  %v2102_v9 = vadd.f32 %v2070_v40, %v1873_v26  ;;  %v4738_v30 = vld [vmem:[#allocation110_spill] sm:$0xff] }
 0x207   : > { %v2006_v15 = vpop.permute.xlu0 %2005  ;;  %v1971_v60 = vpop.permute.xlu1 %1970  ;;  %v1622_v40 = vmul.f32 %v3712_v59, %v4738_v30 }
 0x208   : > { %2141 = vst.msk [vmem:[%s4147_s23 + $0xa0] sm:$0xff] %vm4724_vm3, %v2109_v14  ;;  %v2079_v5 = vmul.f32 %v4134_v20, %v2006_v15  ;;  %v2072_v21 = vmul.f32 %v4134_v20, %v1971_v60  ;;  %v1427_v14 = vmul.f32 %v2557_v10, %v4739_v29  ;;  %v1881_v15 = vadd.f32 %v1849_v25, %v1652_v19  ;;  %v4742_v60 = vld [vmem:[#allocation40_spill] sm:$0xff] }
 0x209   : > { %2134 = vst.msk [vmem:[%s4147_s23 + $0x68] sm:$0xff] %vm4725_vm5, %v2102_v9  ;;  %v4740_v9 = vld [vmem:[#allocation38_spill] sm:$0xff]  ;;  %v1654_v39 = vadd.f32 %v1622_v40, %v1457_v32 }
 0x20a   : > { %v2111_v0 = vadd.f32 %v2079_v5, %v1882_v58  ;;  %v2104_v47 = vadd.f32 %v2072_v21, %v1875_v42  ;;  %v1888_v63 = vadd.f32 %v1856_v17, %v4740_v9  ;;  %v1851_v42 = vmul.f32 %v3983_v37, %v4742_v60  ;;  %v4745_v5 = vld [vmem:[#allocation13_spill] sm:$0xff] }
 0x20b   : > { %v2016_v13 = vpop.permute.xlu0 %2015  ;;  %v1981_v41 = vpop.permute.xlu1 %1980  ;;  %v1459_v21 = vadd.f32 %v1427_v14, %v4745_v5 }
 0x20c   : > { %2143 = vst.msk [vmem:[%s4147_s23 + $0xb0] sm:$0xff] %vm4727_vm6, %v2111_v0  ;;  %v2081_v53 = vmul.f32 %v4134_v20, %v2016_v13  ;;  %v2074_v43 = vmul.f32 %v4134_v20, %v1981_v41  ;;  %v1890_v13 = vadd.f32 %v1858_v36, %v4748_v3  ;;  %v1883_v28 = vadd.f32 %v1851_v42, %v1654_v39 }
 0x20d   : > { %2136 = vst.msk [vmem:[%s4147_s23 + $0x78] sm:$0xff] %vm4728_vm7, %v2104_v47  ;;  %v2558_v47 = vld [vmem:[%s4446_s5 + $0x22] ss:$0 sm:$0xff] }
 0x20e   : > { %v2113_v38 = vadd.f32 %v2081_v53, %v1884_v62  ;;  %v2106_v55 = vadd.f32 %v2074_v43, %v1877_v2  ;;  %v1624_v31 = vmul.f32 %v2558_v47, %v4746_v46  ;;  %v1429_v62 = vmul.f32 %v2557_v10, %v4747_v52 }
 0x20f   : > { %v2026_v11 = vpop.permute.xlu0 %2025  ;;  %v1991_v4 = vpop.permute.xlu1 %1990  ;;  %v1853_v53 = vmul.f32 %v3983_v37, %v4137_v1  ;;  %v1626_v61 = vmul.f32 %v2558_v47, %v4752_v7  ;;  %v1855_v1 = vmul.f32 %v3983_v37, %v4142_v6 }
 0x210   : > { %2145 = vst.msk [vmem:[%s4147_s23 + $0xc0] sm:$0xff] %vm4735_vm8, %v2113_v38  ;;  %v2083_v50 = vmul.f32 %v4134_v20, %v2026_v11  ;;  %v2076_v33 = vmul.f32 %v4134_v20, %v1991_v4  ;;  %v1461_v18 = vadd.f32 %v1429_v62, %v4751_v51  ;;  %v1656_v38 = vadd.f32 %v1624_v31, %v1459_v21 }
 0x211   : > { %2138 = vst.msk [vmem:[%s4147_s23 + $0x88] sm:$0xff] %vm4736_vm9, %v2106_v55 }
 0x212   : > { %v2115_v26 = vadd.f32 %v2083_v50, %v1886_v49  ;;  %v2108_v23 = vadd.f32 %v2076_v33, %v1879_v12  ;;  %v1885_v34 = vadd.f32 %v1853_v53, %v1656_v38  ;;  %v1658_v35 = vadd.f32 %v1626_v61, %v1461_v18  ;;  %v4756_v50 = vld [vmem:[#allocation36_spill] sm:$0xff] }
 0x213   : > { %v2036_v58 = vpop.permute.xlu0 %2035  ;;  %v2001_v45 = vpop.permute.xlu1 %2000  ;;  %v1857_v12 = vmul.f32 %v3983_v37, %v4152_v27 }
 0x214   : > { %2147 = vst.msk [vmem:[%s4147_s23 + $0xd0] sm:$0xff] %vm4743_vm10, %v2115_v26  ;;  %v2085_v59 = vmul.f32 %v4134_v20, %v2036_v58  ;;  %v2078_v57 = vmul.f32 %v4134_v20, %v2001_v45  ;;  %v1887_v4 = vadd.f32 %v1855_v1, %v1658_v35  ;;  %v4757_v26 = vld [vmem:[#allocation8_spill] sm:$0xff] }
 0x215   : > { %2140 = vst.msk [vmem:[%s4147_s23 + $0x98] sm:$0xff] %vm4744_vm11, %v2108_v23  ;;  %v1889_v33 = vadd.f32 %v1857_v12, %v4756_v50  ;;  %v1891_v23 = vadd.f32 %v1859_v44, %v4757_v26 }
 0x216   : > { %v2117_v56 = vadd.f32 %v2085_v59, %v1888_v63  ;;  %v2110_v0 = vadd.f32 %v2078_v57, %v1881_v15 }
 0x217   : > { %v2046_v41 = vpop.permute.xlu0 %2045  ;;  %v2011_v2 = vpop.permute.xlu1 %2010 }
 0x218   : > { %2149 = vst.msk [vmem:[%s4147_s23 + $0xe0] sm:$0xff] %vm4749_vm12, %v2117_v56  ;;  %v2087_v43 = vmul.f32 %v4134_v20, %v2046_v41  ;;  %v2080_v24 = vmul.f32 %v4134_v20, %v2011_v2 }
 0x219   : > { %2142 = vst.msk [vmem:[%s4147_s23 + $0xa8] sm:$0xff] %vm4750_vm1, %v2110_v0 }
 0x21a   : > { %v2119_v55 = vadd.f32 %v2087_v43, %v1890_v13  ;;  %v2112_v8 = vadd.f32 %v2080_v24, %v1883_v28 }
 0x21b   : > { %v2021_v54 = vpop.permute.xlu1 %2020 }
 0x21c   : > { %2151 = vst.msk [vmem:[%s4147_s23 + $0xf0] sm:$0xff] %vm4753_vm2, %v2119_v55  ;;  %v2082_v49 = vmul.f32 %v4134_v20, %v2021_v54 }
 0x21d   : > { %2144 = vst.msk [vmem:[%s4147_s23 + $0xb8] sm:$0xff] %vm4754_vm4, %v2112_v8 }
 0x21e   : > { %v2114_v17 = vadd.f32 %v2082_v49, %v1885_v34 }
 0x21f   : > { %v2031_v11 = vpop.permute.xlu1 %2030 }
 0x220   : > { %2146 = vst.msk [vmem:[%s4147_s23 + $0xc8] sm:$0xff] %vm4755_vm14, %v2114_v17  ;;  %v2084_v6 = vmul.f32 %v4134_v20, %v2031_v11 }
 0x222   : > { %v2116_v16 = vadd.f32 %v2084_v6, %v1887_v4 }
 0x223   : > { %v2041_v25 = vpop.permute.xlu1 %2040 }
 0x224   : > { %2148 = vst.msk [vmem:[%s4147_s23 + $0xd8] sm:$0xff] %vm4718_vm0, %v2116_v16  ;;  %v2086_v32 = vmul.f32 %v4134_v20, %v2041_v25 }
 0x226   : > { %v2118_v19 = vadd.f32 %v2086_v32, %v1889_v33 }
 0x227   : > { %v2051_v27 = vpop.permute.xlu1 %2050 }
 0x228   : > { %2150 = vst.msk [vmem:[%s4147_s23 + $0xe8] sm:$0xff] %vm4758_vm13, %v2118_v19  ;;  %v2088_v30 = vmul.f32 %v4134_v20, %v2051_v27 }
 0x22a   : > { %v2120_v40 = vadd.f32 %v2088_v30, %v1891_v23 }
 0x22c   : > { %2152 = vst.msk [vmem:[%s4147_s23 + $0xf8] sm:$0xff] %vm4759_vm15, %v2120_v40 }
 0x22d   : > { %2600 = shalt.err (!%p2597_p9)
}
 0x22e   : > { %s2601_s23 = scalar_lea.hbm %s4391_s22, 4096  ;;  %s2605_s20 = scalar_lea.hbm %s4448_s7, 8192 }
 0x22f   : > { %p2602_p10 = scmp.ne.s32.totalorder %s4391_s22, %s2601_s23  ;;  %p2606_p13 = scmp.lt.u32.totalorder %s4391_s22, %s4448_s7 }
 0x230   : > { %p2607_p0 = scmp.lt.u32.totalorder %s2605_s20, %s2601_s23  ;;  %p2609_p2 = scmp.lt.u32.totalorder %s2601_s23, %s4391_s22 }
 0x231   : > { %p2603_p11 = pnand %p2602_p10, %p2746_p5 }
 0x232   : > { %p2608_p1 = por %p2607_p0, %p2606_p13 }
 0x233   : > { %p2604_p12 = pneg %p2603_p11 }
 0x234   : > { %p2610_p3 = por %p2609_p2, %p2608_p1 }
 0x236   : > { %p2611_p4 = pnand %p2610_p3, %p2604_p12 }
 0x238   : > { %2614 = shalt.err (!%p2611_p4)
}
 0x239   : > { %2500 = dma.vmem_to_hbm [thread:$0]  (%p2746_p5), %s4393_s24, 4096, %s4391_s22, %s2177_s9, %s2660_s21, %s2660_s21, %s2661_s25  }
 0x23a PF: > { %p2511_p7 = scmp.ge.s32.totalorder %s2653_s30, 2  ;;  %s2226_s26 = sand.u32 1, %s2641_s27  }
 0x23b   : > { %s2227_s13 = scalar_lea.sflag [#allocation3], %s2226_s26 }
 0x23c   : > { %p2505_p8 = pnand %p2511_p7, %p2750_p6 }
 0x23e   : > { %2632 = dma.done.wait (!%p2505_p8), %s2227_s13, 4096  }
 0x23f   : > { %2634 = vsyncadd (!%p2505_p8), %s2227_s13, 4294963200  ;;  %s2236_s15 = scalar_lea.sflag [#allocation5], %s2226_s26 }
 0x240   : > { %2636 = dma.done.wait (!%p2505_p8), %s2236_s15, 512  }
 0x241   : > { %2638 = vsyncadd (!%p2505_p8), %s2236_s15, 4294966784  ;;  %p22_p5 = scmp.ge.s32.totalorder %s2733_s11, 4   ;;  %s4760_s27 = smov %s2645_s28 }
 0x242   : > { %s4761_s28 = smov %s2649_s29  ;;  %s4762_s29 = smov %s2744_s14 }
 0x243   : > { %s4763_s30 = smov %s2733_s11  ;;  %24 = sbr.rel (!%p22_p5) target bundleno = 5 (0x5), region = 108 }
 0x24a   :  { %2241 = vsyncpa [#allocation3], 1 }
 0x24b   :  { %2243 = vsyncpa [#allocation3 + $0x1], 1 }
 0x24c   :  { %2244 = vsyncpa [#allocation5], 1 }
 0x24d   :  { %2246 = vsyncpa [#allocation5 + $0x1], 1 }

</bundles_post_ra>
